<compile_context>
chip_gen: v7x
topology: tpu7x:2x2x1
jax: 0.10.0
libtpu: 0.0.40
codegen_flags: <defaults>
</compile_context>

<pallas_src>
import functools

import jax
import jax.numpy as jnp
from jax.experimental import pallas as pl
from jax.experimental.pallas import tpu as pltpu

EDGE_Z = 1  # same constant mousenet uses


def _round_up(a, m):
    return (a + m - 1) // m * m


# ----------------------------------------------------------------------------
# Parameter construction (host-side glue; mirrors Conv2dMask.__init__ shapes)
# ----------------------------------------------------------------------------
def make_gaussian_kernel_mask_vary_channel(key, peak, sigma, kernel_size,
                                           out_channels, in_channels):
    width = int(sigma * EDGE_Z)
    x = jnp.arange(-width, width + 1, dtype=jnp.float32)
    X, Y = jnp.meshgrid(x, x)
    radius = jnp.sqrt(X ** 2 + Y ** 2)
    probability = peak * jnp.exp(-radius ** 2 / 2.0 / sigma ** 2)   # (K, K)
    assert probability.shape == (kernel_size, kernel_size)
    u = jax.random.uniform(key, (out_channels, in_channels, kernel_size, kernel_size))
    return (u < probability[None, None]).astype(jnp.float32)        # (O, I, K, K)


def make_gate_params(key, in_ch, out_ch, kernel_size, gsh, gsw):
    kw_key, km_key = jax.random.split(key)
    # TODO(synk): nn.init.orthogonal_ is host-side parameter setup; plain normal init here.
    w = 0.1 * jax.random.normal(kw_key, (out_ch, in_ch, kernel_size, kernel_size),
                                dtype=jnp.float32)
    mask = make_gaussian_kernel_mask_vary_channel(km_key, gsh, gsw, kernel_size,
                                                  out_ch, in_ch)
    b = jnp.zeros((out_ch,), jnp.float32)    # nn.init.constant_(bias, 0.0)
    return w * mask, b                       # Conv2dMask uses weight * mask


def pack_convgru_params(wu, wr, wo, bu, br, bo, cin, ch, kernel_size):
    """Masked OIHW gate weights -> fused im2col matmul weights.

    w1_flat: (3*CH, K*K*CTP)   rows = [update | reset | out-gate (x-part only)]
                               cols = tap-major, within a tap: [h | x | bias | 0-pad]
    w2_flat: (CH,   K*K*CH)    out-gate h-part (applied to h*reset), tap-major
    The bias rides the constant ones-row (index CT) of the centre tap.
    """
    K = kernel_size
    KK = K * K
    CT = cin + ch
    CTP = _round_up(CT + 1, 8)               # +1 for the bias/ones row, 8-aligned

    def taps_hx(w):   # (CH, CIN+CH, K, K) -> (KK, CH, CT), cols reordered to [h | x]
        t = jnp.transpose(w, (2, 3, 0, 1)).reshape(KK, ch, CT)
        return jnp.concatenate([t[:, :, cin:], t[:, :, :cin]], axis=-1)

    tu, tr, to = taps_hx(wu), taps_hx(wr), taps_hx(wo)
    to_x = to.at[:, :, :ch].set(0.0)          # out gate: h-part handled in pass 2
    gates = jnp.concatenate([tu, tr, to_x], axis=1)          # (KK, 3*CH, CT)

    w1 = jnp.zeros((KK, 3 * ch, CTP), jnp.float32)
    w1 = w1.at[:, :, :CT].set(gates)
    center = (K // 2) * K + (K // 2)
    bias = jnp.concatenate([bu, br, bo])                      # (3*CH,)
    w1 = w1.at[center, :, CT].set(bias)                       # bias on the ones-row
    w1_flat = jnp.transpose(w1, (1, 0, 2)).reshape(3 * ch, KK * CTP)

    w2 = to[:, :, :ch]                                        # (KK, CH, CH)
    w2_flat = jnp.transpose(w2, (1, 0, 2)).reshape(ch, KK * ch)
    return w1_flat, w2_flat


# ----------------------------------------------------------------------------
# Pallas kernel
# ----------------------------------------------------------------------------
def _convgru_kernel(combs_ref, w1_ref, w2_ref, out_ref, buf1_ref, buf2_ref,
                    *, K, P, W, CH, CTP, NWp, BB, pad):
    # combs_ref: (K*CTP, BB*NWp) -- K pre-masked variants (one per dw) of the
    #            combined [h | x | ones | 0-pad] input; each of the BB batches
    #            occupies its own zero-padded NWp-wide lane segment.
    # Coordinate bookkeeping (must stay in lockstep with the host padding):
    #   real pixel j of in-block batch bb lives at comb lane bb*NWp + 2*pad + j,
    #   acc1 column q maps to comb lane q + pad, output column r to q = r + pad.
    L = BB * NWp - 2 * pad       # pass-1 evaluation width
    L2 = BB * NWp - 4 * pad      # real-output (interior) width

    # ---- pass 1: fused update|reset|out_x gate conv as ONE im2col matmul ----
    # Stack the K*K shifted tap windows along the contraction (sublane) axis.
    # Masking per dw is pre-baked into the comb variants: pure static slices.
    for kh in range(K):
        for kw in range(K):
            t = kh * K + kw
            s = (kh - P) * W + (kw - P)
            buf1_ref[t * CTP:(t + 1) * CTP, :] = (
                combs_ref[kw * CTP:(kw + 1) * CTP, pad + s: pad + s + L])

    acc1 = jnp.dot(w1_ref[...], buf1_ref[...],
                   preferred_element_type=jnp.float32)            # (3*CH, L)

    reset = jax.nn.sigmoid(acc1[CH:2 * CH, :])                    # (CH, L)

    # h*reset per masking variant.  h is exactly zero on every padded column,
    # so hr's borders are zero and pass 2 needs no extra padding logic.
    hr = [combs_ref[v * CTP: v * CTP + CH, pad: pad + L] * reset for v in range(K)]

    # ---- pass 2: out-gate h-part on h*reset, same im2col trick ----
    for kh in range(K):
        for kw in range(K):
            t = kh * K + kw
            s = (kh - P) * W + (kw - P)
            buf2_ref[t * CH:(t + 1) * CH, :] = hr[kw][:, pad + s: pad + s + L2]

    acc2 = jnp.dot(w2_ref[...], buf2_ref[...],
                   preferred_element_type=jnp.float32)            # (CH, L2)

    update = jax.nn.sigmoid(acc1[0:CH, pad: pad + L2])
    out_gate = jnp.tanh(acc1[2 * CH:3 * CH, pad: pad + L2] + acc2)
    h_t = combs_ref[P * CTP: P * CTP + CH, 2 * pad: 2 * pad + L2]   # unmasked h
    new_h = h_t * (1.0 - update) + out_gate * update                # (CH, L2)

    out_ref[:, :L2] = new_h.astype(out_ref.dtype)
    out_ref[:, L2:] = jnp.zeros((CH, 4 * pad), out_ref.dtype)       # tidy tail


def conv_gru_cell_mask(x, h, w1_flat, w2_flat, kernel_size, *, batch_block=None):
    """x: (B, CIN, H, W), h: (B, CH, H, W) -> new hidden state (B, CH, H, W)."""
    B, CIN, Himg, Wimg = x.shape
    CH = h.shape[1]
    K = kernel_size
    P = K // 2
    N = Himg * Wimg
    pad = P * Wimg + P                         # max |flat shift| of a conv tap
    CT = CIN + CH
    CTP = _round_up(CT + 1, 8)                 # [h | x | ones | 0-pad] row count
    NWp = _round_up(N + 4 * pad, 128)          # per-batch lane segment (128-aligned)
    assert NWp >= N + 4 * pad and CTP >= CT + 1

    if batch_block is None:
        # keep >= 2 parallel grid points when possible (v7x has 2 TensorCores),
        # otherwise fold everything into one fat step.
        bb = max(1, B // 2)
        batch_block = bb if B % bb == 0 else 1
    assert B % batch_block == 0
    BB = batch_block
    G = B // BB

    # ---- host-side layout staging (pure data movement) ----------------------
    # combined [h | x | ones | zeros] rows, K pre-masked variants (one per dw),
    # each batch zero-padded by 2*pad on both sides inside its NWp lane segment.
    comb = jnp.concatenate(
        [h.reshape(B, CH, N), x.reshape(B, CIN, N)], axis=1).astype(jnp.float32)
    base = jnp.concatenate(
        [comb,
         jnp.ones((B, 1, N), jnp.float32),
         jnp.zeros((B, CTP - CT - 1, N), jnp.float32)], axis=1)     # (B, CTP, N)

    col = jnp.arange(N, dtype=jnp.int32) % Wimg
    variants = []
    for dw in range(-P, P + 1):
        if dw > 0:
            m = (col >= dw)                  # zero source cols that wrap from row end
        elif dw < 0:
            m = (col < Wimg + dw)            # zero source cols that wrap from row start
        else:
            m = None
        variants.append(base if m is None else base * m.astype(jnp.float32)[None, None, :])
    combs = jnp.stack(variants, axis=1)                             # (B, K, CTP, N)
    combs = jnp.pad(combs, ((0, 0), (0, 0), (0, 0), (2 * pad, NWp - N - 2 * pad)))
    combs = jnp.transpose(combs, (1, 2, 0, 3)).reshape(K * CTP, B * NWp)
    # bias ones-row of the dw=0 variant spans the full padded width
    combs = combs.at[P * CTP + CT, :].set(1.0)

    L = BB * NWp - 2 * pad
    L2 = BB * NWp - 4 * pad

    kernel = functools.partial(_convgru_kernel, K=K, P=P, W=Wimg, CH=CH,
                               CTP=CTP, NWp=NWp, BB=BB, pad=pad)

    out = pl.pallas_call(
        kernel,
        out_shape=jax.ShapeDtypeStruct((CH, B * NWp), x.dtype),
        grid_spec=pltpu.PrefetchScalarGridSpec(
            num_scalar_prefetch=0,
            grid=(G,),
            in_specs=[
                pl.BlockSpec((K * CTP, BB * NWp), lambda g: (0, g)),
                # constant block index -> weights are DMA'd only once across the grid
                pl.BlockSpec(w1_flat.shape, lambda g: (0, 0)),
                pl.BlockSpec(w2_flat.shape, lambda g: (0, 0)),
            ],
            out_specs=pl.BlockSpec((CH, BB * NWp), lambda g: (0, g)),
            scratch_shapes=[
                pltpu.VMEM((K * K * CTP, L), jnp.float32),   # pass-1 im2col buffer
                pltpu.VMEM((K * K * CH, L2), jnp.float32),   # pass-2 im2col buffer
            ],
        ),
        compiler_params=pltpu.CompilerParams(
            dimension_semantics=("parallel",)),
    )(combs, w1_flat.astype(jnp.float32), w2_flat.astype(jnp.float32))

    # batch b real pixels live at lanes [b*NWp, b*NWp + N)
    out = out.reshape(CH, B, NWp)[:, :, :N]
    return jnp.transpose(out, (1, 0, 2)).reshape(B, CH, Himg, Wimg)


# ----------------------------------------------------------------------------
# Pure-JAX reference (mirrors the PyTorch forward, NCHW)
# ----------------------------------------------------------------------------
def _conv_ref(inp_nchw, w_oihw, bias, p):
    out = jax.lax.conv_general_dilated(
        inp_nchw, w_oihw, window_strides=(1, 1),
        padding=[(p, p), (p, p)],
        dimension_numbers=("NCHW", "OIHW", "NCHW"),
        precision=jax.lax.Precision.HIGHEST)
    return out + bias[None, :, None, None]


def conv_gru_ref(x, h, masked_weights, biases, kernel_size):
    wu, wr, wo = masked_weights
    bu, br, bo = biases
    p = kernel_size // 2
    combined = jnp.concatenate([x, h], axis=1)
    update = jax.nn.sigmoid(_conv_ref(combined, wu, bu, p))
    reset = jax.nn.sigmoid(_conv_ref(combined, wr, br, p))
    combined2 = jnp.concatenate([x, h * reset], axis=1)
    out = jnp.tanh(_conv_ref(combined2, wo, bo, p))
    return h * (1.0 - update) + out * update


# ----------------------------------------------------------------------------
if __name__ == "__main__":
    B, H, W = 2, 16, 16
    INPUT_SIZE, HIDDEN_SIZE = 4, 8
    KERNEL_SIZE = 3
    GSH, GSW = 0.8, 1.0   # gsw * EDGE_Z == 1 -> 3x3 Gaussian mask

    key = jax.random.PRNGKey(0)
    kx, kh, ku, kr, ko = jax.random.split(key, 5)

    x = jax.random.normal(kx, (B, INPUT_SIZE, H, W), dtype=jnp.float32)
    h0 = jax.random.normal(kh, (B, HIDDEN_SIZE, H, W), dtype=jnp.float32)

    in_total = INPUT_SIZE + HIDDEN_SIZE
    wu, bu = make_gate_params(ku, in_total, HIDDEN_SIZE, KERNEL_SIZE, GSH, GSW)
    wr, br = make_gate_params(kr, in_total, HIDDEN_SIZE, KERNEL_SIZE, GSH, GSW)
    wo, bo = make_gate_params(ko, in_total, HIDDEN_SIZE, KERNEL_SIZE, GSH, GSW)

    w1f, w2f = pack_convgru_params(wu, wr, wo, bu, br, bo,
                                   INPUT_SIZE, HIDDEN_SIZE, KERNEL_SIZE)

    ref = conv_gru_ref(x, h0, (wu, wr, wo), (bu, br, bo), KERNEL_SIZE)

    # default: one batch per grid step -> grid=(2,) "parallel" (both v7x TCs busy)
    new_h = conv_gru_cell_mask(x, h0, w1f, w2f, KERNEL_SIZE)
    new_h = jax.block_until_ready(new_h)
    assert new_h.shape == (B, HIDDEN_SIZE, H, W)
    err = float(jnp.max(jnp.abs(new_h - ref)))
    assert jnp.allclose(new_h, ref, atol=1e-2, rtol=1e-2), err

    # batch-folded path: both batches in one fat grid step (best on 1-TC chips)
    new_h2 = conv_gru_cell_mask(x, h0, w1f, w2f, KERNEL_SIZE, batch_block=2)
    new_h2 = jax.block_until_ready(new_h2)
    err2 = float(jnp.max(jnp.abs(new_h2 - ref)))
    assert jnp.allclose(new_h2, ref, atol=1e-2, rtol=1e-2), err2

    print("KERNEL_OK")
</pallas_src>

<mosaic_0001>
module attributes {stable_mosaic.version = 11 : i64} {
  func.func @_convgru_kernel(%arg0: i32, %arg1: memref<48x384xf32, #tpu.memory_space<vmem>>, %arg2: memref<24x144xf32, #tpu.memory_space<vmem>>, %arg3: memref<8x72xf32, #tpu.memory_space<vmem>>, %arg4: memref<8x384xf32, #tpu.memory_space<vmem>>, %arg5: memref<144x350xf32, #tpu.memory_space<vmem>>, %arg6: memref<72x316xf32, #tpu.memory_space<vmem>>) attributes {dimension_semantics = [#tpu.dimension_semantics<parallel>], iteration_bounds = array<i64: 2>, scalar_prefetch = 0 : i64, scratch_operands = 2 : i64, tpu.core_type = #tpu.core_type<tc>, window_params = [{transform_indices = @transform_0, window_bounds = array<i64: 48, 384>}, {pipeline_mode = #tpu.pipeline_mode<synchronous>, transform_indices = @transform_1, window_bounds = array<i64: 24, 144>}, {pipeline_mode = #tpu.pipeline_mode<synchronous>, transform_indices = @transform_2, window_bounds = array<i64: 8, 72>}, {transform_indices = @transform_3, window_bounds = array<i64: 8, 384>}]} {
    %c0 = arith.constant 0 : index
    %c0_0 = arith.constant 0 : index
    %0 = vector.load %arg1[%c0, %c0_0] : memref<48x384xf32, #tpu.memory_space<vmem>>, vector<16x350xf32>
    %c0_1 = arith.constant 0 : index
    %c0_2 = arith.constant 0 : index
    %1 = vector.load %arg5[%c0_1, %c0_2] : memref<144x350xf32, #tpu.memory_space<vmem>>, vector<16x350xf32>
    tpu.vector_store %arg5[%c0_1, %c0_2], %0 {strides = array<i32>} : memref<144x350xf32, #tpu.memory_space<vmem>>, vector<16x350xf32>,
    %c16 = arith.constant 16 : index
    %c1 = arith.constant 1 : index
    %2 = vector.load %arg1[%c16, %c1] : memref<48x384xf32, #tpu.memory_space<vmem>>, vector<16x350xf32>
    %c16_3 = arith.constant 16 : index
    %c0_4 = arith.constant 0 : index
    %3 = vector.load %arg5[%c16_3, %c0_4] : memref<144x350xf32, #tpu.memory_space<vmem>>, vector<16x350xf32>
    tpu.vector_store %arg5[%c16_3, %c0_4], %2 {strides = array<i32>} : memref<144x350xf32, #tpu.memory_space<vmem>>, vector<16x350xf32>,
    %c32 = arith.constant 32 : index
    %c2 = arith.constant 2 : index
    %4 = vector.load %arg1[%c32, %c2] : memref<48x384xf32, #tpu.memory_space<vmem>>, vector<16x350xf32>
    %c32_5 = arith.constant 32 : index
    %c0_6 = arith.constant 0 : index
    %5 = vector.load %arg5[%c32_5, %c0_6] : memref<144x350xf32, #tpu.memory_space<vmem>>, vector<16x350xf32>
    tpu.vector_store %arg5[%c32_5, %c0_6], %4 {strides = array<i32>} : memref<144x350xf32, #tpu.memory_space<vmem>>, vector<16x350xf32>,
    %c0_7 = arith.constant 0 : index
    %c16_8 = arith.constant 16 : index
    %6 = vector.load %arg1[%c0_7, %c16_8] : memref<48x384xf32, #tpu.memory_space<vmem>>, vector<16x350xf32>
    %c48 = arith.constant 48 : index
    %c0_9 = arith.constant 0 : index
    %7 = vector.load %arg5[%c48, %c0_9] : memref<144x350xf32, #tpu.memory_space<vmem>>, vector<16x350xf32>
    tpu.vector_store %arg5[%c48, %c0_9], %6 {strides = array<i32>} : memref<144x350xf32, #tpu.memory_space<vmem>>, vector<16x350xf32>,
    %c16_10 = arith.constant 16 : index
    %c17 = arith.constant 17 : index
    %8 = vector.load %arg1[%c16_10, %c17] : memref<48x384xf32, #tpu.memory_space<vmem>>, vector<16x350xf32>
    %c64 = arith.constant 64 : index
    %c0_11 = arith.constant 0 : index
    %9 = vector.load %arg5[%c64, %c0_11] : memref<144x350xf32, #tpu.memory_space<vmem>>, vector<16x350xf32>
    tpu.vector_store %arg5[%c64, %c0_11], %8 {strides = array<i32>} : memref<144x350xf32, #tpu.memory_space<vmem>>, vector<16x350xf32>,
    %c32_12 = arith.constant 32 : index
    %c18 = arith.constant 18 : index
    %10 = vector.load %arg1[%c32_12, %c18] : memref<48x384xf32, #tpu.memory_space<vmem>>, vector<16x350xf32>
    %c80 = arith.constant 80 : index
    %c0_13 = arith.constant 0 : index
    %11 = vector.load %arg5[%c80, %c0_13] : memref<144x350xf32, #tpu.memory_space<vmem>>, vector<16x350xf32>
    tpu.vector_store %arg5[%c80, %c0_13], %10 {strides = array<i32>} : memref<144x350xf32, #tpu.memory_space<vmem>>, vector<16x350xf32>,
    %c0_14 = arith.constant 0 : index
    %c32_15 = arith.constant 32 : index
    %12 = vector.load %arg1[%c0_14, %c32_15] : memref<48x384xf32, #tpu.memory_space<vmem>>, vector<16x350xf32>
    %c96 = arith.constant 96 : index
    %c0_16 = arith.constant 0 : index
    %13 = vector.load %arg5[%c96, %c0_16] : memref<144x350xf32, #tpu.memory_space<vmem>>, vector<16x350xf32>
    tpu.vector_store %arg5[%c96, %c0_16], %12 {strides = array<i32>} : memref<144x350xf32, #tpu.memory_space<vmem>>, vector<16x350xf32>,
    %c16_17 = arith.constant 16 : index
    %c33 = arith.constant 33 : index
    %14 = vector.load %arg1[%c16_17, %c33] : memref<48x384xf32, #tpu.memory_space<vmem>>, vector<16x350xf32>
    %c112 = arith.constant 112 : index
    %c0_18 = arith.constant 0 : index
    %15 = vector.load %arg5[%c112, %c0_18] : memref<144x350xf32, #tpu.memory_space<vmem>>, vector<16x350xf32>
    tpu.vector_store %arg5[%c112, %c0_18], %14 {strides = array<i32>} : memref<144x350xf32, #tpu.memory_space<vmem>>, vector<16x350xf32>,
    %c32_19 = arith.constant 32 : index
    %c34 = arith.constant 34 : index
    %16 = vector.load %arg1[%c32_19, %c34] : memref<48x384xf32, #tpu.memory_space<vmem>>, vector<16x350xf32>
    %c128 = arith.constant 128 : index
    %c0_20 = arith.constant 0 : index
    %17 = vector.load %arg5[%c128, %c0_20] : memref<144x350xf32, #tpu.memory_space<vmem>>, vector<16x350xf32>
    tpu.vector_store %arg5[%c128, %c0_20], %16 {strides = array<i32>} : memref<144x350xf32, #tpu.memory_space<vmem>>, vector<16x350xf32>,
    %c0_21 = arith.constant 0 : index
    %c0_22 = arith.constant 0 : index
    %18 = vector.load %arg2[%c0_21, %c0_22] : memref<24x144xf32, #tpu.memory_space<vmem>>, vector<24x144xf32>
    %c0_23 = arith.constant 0 : index
    %c0_24 = arith.constant 0 : index
    %19 = vector.load %arg5[%c0_23, %c0_24] : memref<144x350xf32, #tpu.memory_space<vmem>>, vector<144x350xf32>
    %cst = arith.constant dense<0.000000e+00> : vector<24x350xf32>
    %20 = tpu.matmul %18, %19, %cst {dimension_numbers = #tpu.dot_dimension_numbers<[1], [0], [0], [1], [0, 0, 1, 1], [], []>} : vector<24x144xf32>, vector<144x350xf32>, vector<24x350xf32> -> vector<24x350xf32>
    %21 = vector.extract_strided_slice %20 {offsets = [8, 0], sizes = [8, 350], strides = [1, 1]} : vector<24x350xf32> to vector<8x350xf32>
    %22 = arith.negf %21 : vector<8x350xf32>
    %23 = math.exp %22 : vector<8x350xf32>
    %cst_25 = arith.constant 1.000000e+00 : f32
    %24 = vector.broadcast %cst_25 : f32 to vector<8x350xf32>
    %25 = arith.addf %24, %23 : vector<8x350xf32>
    %26 = arith.divf %24, %25 : vector<8x350xf32>
    %c0_26 = arith.constant 0 : index
    %c17_27 = arith.constant 17 : index
    %27 = vector.load %arg1[%c0_26, %c17_27] : memref<48x384xf32, #tpu.memory_space<vmem>>, vector<8x350xf32>
    %28 = arith.mulf %27, %26 : vector<8x350xf32>
    %c16_28 = arith.constant 16 : index
    %c17_29 = arith.constant 17 : index
    %29 = vector.load %arg1[%c16_28, %c17_29] : memref<48x384xf32, #tpu.memory_space<vmem>>, vector<8x350xf32>
    %30 = arith.mulf %29, %26 : vector<8x350xf32>
    %c32_30 = arith.constant 32 : index
    %c17_31 = arith.constant 17 : index
    %31 = vector.load %arg1[%c32_30, %c17_31] : memref<48x384xf32, #tpu.memory_space<vmem>>, vector<8x350xf32>
    %32 = arith.mulf %31, %26 : vector<8x350xf32>
    %33 = vector.extract_strided_slice %28 {offsets = [0, 0], sizes = [8, 316], strides = [1, 1]} : vector<8x350xf32> to vector<8x316xf32>
    %c0_32 = arith.constant 0 : index
    %c0_33 = arith.constant 0 : index
    %34 = vector.load %arg6[%c0_32, %c0_33] : memref<72x316xf32, #tpu.memory_space<vmem>>, vector<8x316xf32>
    tpu.vector_store %arg6[%c0_32, %c0_33], %33 {strides = array<i32>} : memref<72x316xf32, #tpu.memory_space<vmem>>, vector<8x316xf32>,
    %35 = vector.extract_strided_slice %30 {offsets = [0, 1], sizes = [8, 316], strides = [1, 1]} : vector<8x350xf32> to vector<8x316xf32>
    %c8 = arith.constant 8 : index
    %c0_34 = arith.constant 0 : index
    %36 = vector.load %arg6[%c8, %c0_34] : memref<72x316xf32, #tpu.memory_space<vmem>>, vector<8x316xf32>
    tpu.vector_store %arg6[%c8, %c0_34], %35 {strides = array<i32>} : memref<72x316xf32, #tpu.memory_space<vmem>>, vector<8x316xf32>,
    %37 = vector.extract_strided_slice %32 {offsets = [0, 2], sizes = [8, 316], strides = [1, 1]} : vector<8x350xf32> to vector<8x316xf32>
    %c16_35 = arith.constant 16 : index
    %c0_36 = arith.constant 0 : index
    %38 = vector.load %arg6[%c16_35, %c0_36] : memref<72x316xf32, #tpu.memory_space<vmem>>, vector<8x316xf32>
    tpu.vector_store %arg6[%c16_35, %c0_36], %37 {strides = array<i32>} : memref<72x316xf32, #tpu.memory_space<vmem>>, vector<8x316xf32>,
    %39 = vector.extract_strided_slice %28 {offsets = [0, 16], sizes = [8, 316], strides = [1, 1]} : vector<8x350xf32> to vector<8x316xf32>
    %c24 = arith.constant 24 : index
    %c0_37 = arith.constant 0 : index
    %40 = vector.load %arg6[%c24, %c0_37] : memref<72x316xf32, #tpu.memory_space<vmem>>, vector<8x316xf32>
    tpu.vector_store %arg6[%c24, %c0_37], %39 {strides = array<i32>} : memref<72x316xf32, #tpu.memory_space<vmem>>, vector<8x316xf32>,
    %41 = vector.extract_strided_slice %30 {offsets = [0, 17], sizes = [8, 316], strides = [1, 1]} : vector<8x350xf32> to vector<8x316xf32>
    %c32_38 = arith.constant 32 : index
    %c0_39 = arith.constant 0 : index
    %42 = vector.load %arg6[%c32_38, %c0_39] : memref<72x316xf32, #tpu.memory_space<vmem>>, vector<8x316xf32>
    tpu.vector_store %arg6[%c32_38, %c0_39], %41 {strides = array<i32>} : memref<72x316xf32, #tpu.memory_space<vmem>>, vector<8x316xf32>,
    %43 = vector.extract_strided_slice %32 {offsets = [0, 18], sizes = [8, 316], strides = [1, 1]} : vector<8x350xf32> to vector<8x316xf32>
    %c40 = arith.constant 40 : index
    %c0_40 = arith.constant 0 : index
    %44 = vector.load %arg6[%c40, %c0_40] : memref<72x316xf32, #tpu.memory_space<vmem>>, vector<8x316xf32>
    tpu.vector_store %arg6[%c40, %c0_40], %43 {strides = array<i32>} : memref<72x316xf32, #tpu.memory_space<vmem>>, vector<8x316xf32>,
    %45 = vector.extract_strided_slice %28 {offsets = [0, 32], sizes = [8, 316], strides = [1, 1]} : vector<8x350xf32> to vector<8x316xf32>
    %c48_41 = arith.constant 48 : index
    %c0_42 = arith.constant 0 : index
    %46 = vector.load %arg6[%c48_41, %c0_42] : memref<72x316xf32, #tpu.memory_space<vmem>>, vector<8x316xf32>
    tpu.vector_store %arg6[%c48_41, %c0_42], %45 {strides = array<i32>} : memref<72x316xf32, #tpu.memory_space<vmem>>, vector<8x316xf32>,
    %47 = vector.extract_strided_slice %30 {offsets = [0, 33], sizes = [8, 316], strides = [1, 1]} : vector<8x350xf32> to vector<8x316xf32>
    %c56 = arith.constant 56 : index
    %c0_43 = arith.constant 0 : index
    %48 = vector.load %arg6[%c56, %c0_43] : memref<72x316xf32, #tpu.memory_space<vmem>>, vector<8x316xf32>
    tpu.vector_store %arg6[%c56, %c0_43], %47 {strides = array<i32>} : memref<72x316xf32, #tpu.memory_space<vmem>>, vector<8x316xf32>,
    %49 = vector.extract_strided_slice %32 {offsets = [0, 34], sizes = [8, 316], strides = [1, 1]} : vector<8x350xf32> to vector<8x316xf32>
    %c64_44 = arith.constant 64 : index
    %c0_45 = arith.constant 0 : index
    %50 = vector.load %arg6[%c64_44, %c0_45] : memref<72x316xf32, #tpu.memory_space<vmem>>, vector<8x316xf32>
    tpu.vector_store %arg6[%c64_44, %c0_45], %49 {strides = array<i32>} : memref<72x316xf32, #tpu.memory_space<vmem>>, vector<8x316xf32>,
    %c0_46 = arith.constant 0 : index
    %c0_47 = arith.constant 0 : index
    %51 = vector.load %arg3[%c0_46, %c0_47] : memref<8x72xf32, #tpu.memory_space<vmem>>, vector<8x72xf32>
    %c0_48 = arith.constant 0 : index
    %c0_49 = arith.constant 0 : index
    %52 = vector.load %arg6[%c0_48, %c0_49] : memref<72x316xf32, #tpu.memory_space<vmem>>, vector<72x316xf32>
    %cst_50 = arith.constant dense<0.000000e+00> : vector<8x316xf32>
    %53 = tpu.matmul %51, %52, %cst_50 {dimension_numbers = #tpu.dot_dimension_numbers<[1], [0], [0], [1], [0, 0, 1, 1], [], []>} : vector<8x72xf32>, vector<72x316xf32>, vector<8x316xf32> -> vector<8x316xf32>
    %54 = vector.extract_strided_slice %20 {offsets = [0, 17], sizes = [8, 316], strides = [1, 1]} : vector<24x350xf32> to vector<8x316xf32>
    %55 = arith.negf %54 : vector<8x316xf32>
    %56 = math.exp %55 : vector<8x316xf32>
    %cst_51 = arith.constant 1.000000e+00 : f32
    %57 = vector.broadcast %cst_51 : f32 to vector<8x316xf32>
    %58 = arith.addf %57, %56 : vector<8x316xf32>
    %59 = arith.divf %57, %58 : vector<8x316xf32>
    %60 = vector.extract_strided_slice %20 {offsets = [16, 17], sizes = [8, 316], strides = [1, 1]} : vector<24x350xf32> to vector<8x316xf32>
    %61 = arith.addf %60, %53 : vector<8x316xf32>
    %62 = math.tanh %61 : vector<8x316xf32>
    %c16_52 = arith.constant 16 : index
    %c34_53 = arith.constant 34 : index
    %63 = vector.load %arg1[%c16_52, %c34_53] : memref<48x384xf32, #tpu.memory_space<vmem>>, vector<8x316xf32>
    %cst_54 = arith.constant 1.000000e+00 : f32
    %64 = vector.broadcast %cst_54 : f32 to vector<8x316xf32>
    %65 = arith.subf %64, %59 : vector<8x316xf32>
    %66 = arith.mulf %63, %65 : vector<8x316xf32>
    %67 = arith.mulf %62, %59 : vector<8x316xf32>
    %68 = arith.addf %66, %67 : vector<8x316xf32>
    %c0_55 = arith.constant 0 : index
    %c0_56 = arith.constant 0 : index
    %69 = vector.load %arg4[%c0_55, %c0_56] : memref<8x384xf32, #tpu.memory_space<vmem>>, vector<8x316xf32>
    tpu.vector_store %arg4[%c0_55, %c0_56], %68 {strides = array<i32>} : memref<8x384xf32, #tpu.memory_space<vmem>>, vector<8x316xf32>,
    %cst_57 = arith.constant 0.000000e+00 : f32
    %70 = vector.broadcast %cst_57 : f32 to vector<8x68xf32>
    %c0_58 = arith.constant 0 : index
    %c316 = arith.constant 316 : index
    %71 = vector.load %arg4[%c0_58, %c316] : memref<8x384xf32, #tpu.memory_space<vmem>>, vector<8x68xf32>
    tpu.vector_store %arg4[%c0_58, %c316], %70 {strides = array<i32>} : memref<8x384xf32, #tpu.memory_space<vmem>>, vector<8x68xf32>,
    return
  }
  func.func @transform_0(%arg0: i32) -> (i32, i32) {
    %c0_i32 = arith.constant 0 : i32
    %c0_i32_0 = arith.constant 0 : i32
    return %c0_i32, %arg0 : i32, i32
  }
  func.func @transform_1(%arg0: i32) -> (i32, i32) {
    %c0_i32 = arith.constant 0 : i32
    %c0_i32_0 = arith.constant 0 : i32
    %c0_i32_1 = arith.constant 0 : i32
    return %c0_i32, %c0_i32_0 : i32, i32
  }
  func.func @transform_2(%arg0: i32) -> (i32, i32) {
    %c0_i32 = arith.constant 0 : i32
    %c0_i32_0 = arith.constant 0 : i32
    %c0_i32_1 = arith.constant 0 : i32
    return %c0_i32, %c0_i32_0 : i32, i32
  }
  func.func @transform_3(%arg0: i32) -> (i32, i32) {
    %c0_i32 = arith.constant 0 : i32
    %c0_i32_0 = arith.constant 0 : i32
    return %c0_i32, %arg0 : i32, i32
  }
}

</mosaic_0001>

<bundles_post_ra>
// kernel: tpu_custom_call.1
= control target key start
LH: loop header
LB: loop body
LE: loop exit
PB: predicated region body
PF: predicated region fallthrough
CT: control target
= control target key end

     0   :  { %8 = vsyncpa [#allocation5], 0  ;;  %s2312_s0 = inlined_call_operand.hbm [shape: f32[48,768], index: 0, kind: input, shape index: {}]   ;;  %s2313_s1 = inlined_call_operand.hbm [shape: f32[24,144], index: 1, kind: input, shape index: {}]   ;;  %s2314_s2 = inlined_call_operand.hbm [shape: f32[8,72], index: 2, kind: input, shape index: {}]   ;;  %s2315_s3 = inlined_call_operand.hbm [shape: f32[8,768], index: 3, kind: output, shape index: {}]  }
   0x1   :  { %10 = vsyncpa [#allocation5 + $0x1], 0 }
   0x2   :  { %11 = vsyncpa [#allocation8], 0 }
   0x3   :  { %12 = vsyncpa [#allocation6], 0 }
   0x4   :  { %14 = vsyncpa [#allocation6 + $0x1], 0  ;;  %s1836_s12 = smov 0   ;;  %s1838_s13 = smov 0  }
   0x5   :  { %s1840_s14 = smov 0   ;;  %s1842_s15 = smov 0  }
   0x6 LB: > { %s1857_s16 = sadd.s32 4294967295, %s1788_s15   ;;  %s1360_s17 = sadd.s32 4294967294, %s1788_s15   ;;  %s1788_s15 = sphi %s1842_s15, %s2341_s15   ;;  %s1784_s14 = sphi %s1840_s14, %s2340_s14   ;;  %s1780_s13 = sphi %s1838_s13, %s2339_s13   ;;  %s1776_s12 = sphi %s1836_s12, %s2338_s12  }
   0x7   : > { %s1861_s18 = sadd.s32 1, %s1788_s15   ;;  %s27_s19 = sadd.s32 1, %s1784_s14 }
   0x8   : > { %s24_s20 = ssub.s32 %s1788_s15, %s1861_s18  ;;  %p34_p0 = scmp.ne.s32.totalorder %s1784_s14, %s1780_s13 }
   0x9   : > { %p25_p1 = scmp.eq.s32.totalorder %s24_s20, 0  ;;  %p35_p2 = scmp.eq.s32.totalorder %s1788_s15, 0 }
   0xa   : > { %p40_p3 = scmp.ne.s32.totalorder %s1780_s13, %s1776_s12  ;;  %p2316_p4 = scmp.eq.s32.totalorder %s1857_s16, 0 }
   0xb   : > { %s1873_s21 = scalar_select %p25_p1, %s1784_s14, %s27_s19  }
   0xc   : > { %p1875_p5 = por %p35_p2, %p34_p0  ;;  %p1881_p6 = por %p2316_p4, %p40_p3 }
   0xd   : > { %p106_p7 = scmp.eq.s32.totalorder %s1857_s16, 1  ;;  %p112_p8 = scmp.eq.s32.totalorder %s1360_s17, 1 }
   0xe   : > { %s2321_s22 = scalar_select %p1875_p5, 1, 0 }
   0xf   : > { %s2322_s23 = scalar_select %p1881_p6, 1, 0 }
  0x10   : > { %p1361_p9 = scmp.ge.s32.totalorder %s1788_s15, 1  ;;  %p119_p10 = scmp.lt.s32.totalorder %s1788_s15, 3 }
  0x11   : > { %p1888_p11 = por %p106_p7, %p34_p0  ;;  %p1892_p12 = por %p112_p8, %p40_p3 }
  0x12   : > { %p1896_p13 = pnand %p1361_p9, %p119_p10  ;;  %s1790_s27 = smov [#allocation7]  }
  0x13   : > { %s2323_s24 = scalar_select %p1888_p11, 1, 0 }
  0x14   : > { %s2324_s25 = scalar_select %p1892_p12, 1, 0 }
  0x15   : > { %s2325_s26 = scalar_select %p1896_p13, 1, 0 }
  0x16   : > { %p1525_p1 = pneg %p1896_p13  ;;  %s131_s28 = sshll.u32 %s1790_s27, 4  ;;  %s132_s28 = int_to_ptr.vmem [resolvable:$true] %s131_s28 }
  0x17   : > { %s1791_s30 = smov [#allocation9]   ;;  %s1632_s7 = scalar_lea.hbm %s2313_s1, 768 }
  0x18   : > { %p1904_p2 = pnand %p1525_p1, %p2316_p4  ;;  %s145_s4 = sshll.u32 %s1791_s30, 4  ;;  %s146_s4 = int_to_ptr.vmem [resolvable:$true] %s145_s4 }
  0x19   : > { %p1633_p7 = scmp.ne.s32.totalorder %s2313_s1, %s1632_s7  ;;  %p1639_p1 = scmp.lt.u32.totalorder %s1632_s7, %s2313_s1 }
  0x1a   : > { %p1634_p8 = pneg %p1904_p2 }
  0x1c   : > { %p1635_p9 = pnand %p1634_p8, %p1633_p7 }
  0x1e   : > { %p1636_p10 = pneg %p1635_p9 }
  0x20   : > { %p1641_p0 = pnand %p1639_p1, %p1636_p10 }
  0x22   : > { %1644 = shalt.err (!%p1641_p0)
}
  0x23   : > { %s1645_s17 = scalar_lea.vmem %s132_s28, 768  ;;  %p1653_p11 = scmp.lt.s32.totalorder %s132_s28, %s132_s28 }
  0x24   : > { %p1646_p4 = scmp.ne.s32.totalorder %s132_s28, %s1645_s17  ;;  %p1654_p6 = scmp.lt.s32.totalorder %s1645_s17, %s1645_s17 }
  0x26   : > { %p1648_p3 = pnand %p1646_p4, %p1634_p8  ;;  %p1655_p13 = por %p1654_p6, %p1653_p11 }
  0x28   : > { %p1649_p12 = pneg %p1648_p3 }
  0x2a   : > { %p1656_p5 = pnand %p1655_p13, %p1649_p12 }
  0x2c   : > { %1659 = shalt.err (!%p1656_p5)
}
  0x2d   : > { %s1792_s19 = smov 256   ;;  %s1793_s20 = smov 16  }
  0x2e   : > { %1528 = dma.hbm_to_vmem [thread:$0]  (!%p1904_p2), %s2313_s1, 768, %s132_s28, [#allocation8], %s1792_s19, %s1792_s19, %s1793_s20  }
  0x2f   : > { %p2327_p0 = scmp.ne.s32.totalorder %s2321_s22, 0  ;;  %p2328_p7 = scmp.lt.s32.totalorder %s1788_s15, 2 }
  0x30   : > { %s1660_s8 = scalar_lea.hbm %s2314_s2, 128 }
  0x31   : > { %p1936_p4 = pnand %p2328_p7, %p2327_p0  ;;  %p1661_p5 = scmp.ne.s32.totalorder %s2314_s2, %s1660_s8 }
  0x32   : > { %p1667_p12 = scmp.lt.u32.totalorder %s1660_s8, %s2314_s2 }
  0x33   : > { %s2329_s5 = scalar_select %p1936_p4, 1, 0 }
  0x34   : > { %p1663_p6 = pnand %p1661_p5, %p1634_p8 }
  0x36   : > { %p1664_p11 = pneg %p1663_p6 }
  0x38   : > { %p1669_p13 = pnand %p1667_p12, %p1664_p11 }
  0x3a   : > { %1672 = shalt.err (!%p1669_p13)
}
  0x3b   : > { %s1673_s11 = scalar_lea.vmem %s146_s4, 128  ;;  %p1681_p1 = scmp.lt.s32.totalorder %s146_s4, %s146_s4 }
  0x3c   : > { %p1674_p3 = scmp.ne.s32.totalorder %s146_s4, %s1673_s11  ;;  %p1682_p0 = scmp.lt.s32.totalorder %s1673_s11, %s1673_s11 }
  0x3e   : > { %p1676_p9 = pnand %p1674_p3, %p1634_p8  ;;  %p1683_p7 = por %p1682_p0, %p1681_p1 }
  0x40   : > { %p1677_p10 = pneg %p1676_p9 }
  0x42   : > { %p1684_p4 = pnand %p1683_p7, %p1677_p10 }
  0x44   : > { %1687 = shalt.err (!%p1684_p4)
}
  0x45   : > { %1531 = dma.hbm_to_vmem [thread:$0]  (!%p1904_p2), %s2314_s2, 128, %s146_s4, [#allocation8]  }
  0x46   : > { %s156_s20 = sand.u32 1, %s1784_s14   ;;  %s1386_s30 = smul.u32 384, %s1788_s15 }
  0x47   : > { %s1510_s27 = smul.u32 144, %s156_s20  ;;  %s1969_s10 = scalar_lea.sflag [#allocation5], %s156_s20 }
  0x48   : > { %s1965_s8 = scalar_lea.hbm %s2312_s0, %s1386_s30  ;;  %p2330_p8 = scmp.ne.s32.totalorder %s2329_s5, 0 }
  0x49   : > { %s160_s29 = scalar_lea.vmem [#allocation4], %s1510_s27  ;;  %s1688_s28 = scalar_lea.hbm %s1965_s8, 2304 }
  0x4a   : > { %s167_s9 = sshll.u32 %s160_s29, 4  ;;  %p1689_p2 = scmp.ne.s32.totalorder %s1965_s8, %s1688_s28  ;;  %s1967_s9 = int_to_ptr.vmem [resolvable:$true] %s167_s9 }
  0x4b   : > { %p1690_p4 = pneg %p2330_p8  ;;  %s1693_s11 = scalar_lea.hbm %s2312_s0, 4608 }
  0x4c   : > { %p1694_p11 = scmp.lt.u32.totalorder %s1965_s8, %s2312_s0  ;;  %p1695_p12 = scmp.lt.u32.totalorder %s1693_s11, %s1688_s28 }
  0x4d   : > { %p1691_p5 = pnand %p1690_p4, %p1689_p2  ;;  %p1697_p3 = scmp.lt.u32.totalorder %s1688_s28, %s1965_s8 }
  0x4e   : > { %p1696_p13 = por %p1695_p12, %p1694_p11 }
  0x4f   : > { %p1692_p6 = pneg %p1691_p5 }
  0x50   : > { %p1698_p9 = por %p1697_p3, %p1696_p13 }
  0x52   : > { %p1699_p10 = pnand %p1698_p9, %p1692_p6 }
  0x54   : > { %1702 = shalt.err (!%p1699_p10)
}
  0x55   : > { %s1703_s20 = scalar_lea.vmem %s1967_s9, 2304  ;;  %s1794_s27 = smov [#allocation4]  }
  0x56   : > { %p1704_p1 = scmp.ne.s32.totalorder %s1967_s9, %s1703_s20  ;;  %s1708_s30 = sshll.u32 %s1794_s27, 4  ;;  %s1709_s30 = int_to_ptr.vmem [resolvable:$false] %s1708_s30 }
  0x57   : > { %s1710_s6 = scalar_lea.vmem %s1709_s30, 4608  ;;  %p1711_p2 = scmp.lt.s32.totalorder %s1967_s9, %s1709_s30 }
  0x58   : > { %p1706_p0 = pnand %p1704_p1, %p1690_p4  ;;  %p1712_p5 = scmp.lt.s32.totalorder %s1710_s6, %s1703_s20 }
  0x5a   : > { %p1707_p7 = pneg %p1706_p0  ;;  %p1713_p11 = por %p1712_p5, %p1711_p2 }
  0x5c   : > { %p1714_p12 = pnand %p1713_p11, %p1707_p7 }
  0x5e   : > { %1717 = shalt.err (!%p1714_p12)
}
  0x5f   : > { %s1795_s7 = smov 768   ;;  %s1796_s29 = smov 384  }
  0x60   : > { %s1797_s28 = smov 24   ;;  %p2331_p4 = scmp.ne.s32.totalorder %s2325_s26, 0 }
  0x61   : > { %1535 = dma.hbm_to_vmem [thread:$0]  (!%p2330_p8), %s1965_s8, 2304, %s1967_s9, %s1969_s10, %s1795_s7, %s1796_s29, %s1797_s28  }
  0x62   : > { %179 = sbr.rel (%p2331_p4) target bundleno = 1447 (0x5a7), region = 32  ;;  %s2000_s4 = sand.u32 (!%p2331_p4), 1, %s1780_s13  }
  0x63   : > { %s1511_s22 = smul.u32 (!%p2331_p4), 144, %s2000_s4  ;;  %s182_s11 = scalar_lea.sflag (!%p2331_p4), [#allocation5], %s2000_s4 }
  0x64   : > { %p2332_p6 = scmp.ne.s32.totalorder (!%p2331_p4), %s2322_s23, 0 }
  0x65   : > { %s2004_s17 = scalar_lea.vmem (!%p2331_p4), [#allocation4], %s1511_s22 }
  0x69   : > { %1763 = dma.done.wait (%p2332_p6), %s182_s11, 2304  }
  0x6a   : > { %1765 = vsyncadd (%p2332_p6), %s182_s11, 4294964992  ;;  %p2333_p8 = scmp.eq.s32.totalorder %s1857_s16, 0 }
  0x6c   : > { %1767 = dma.done.wait (%p2333_p8), [#allocation8], 896   ;;  %p2334_p13 = pmov %p2333_p8 }
  0x6d   : > { %v1798_v0 = vmov 0.0|0.0   ;;  %v2016_v1 = vld [vmem:[%s2004_s17 + $0x50] sm:$0xff]  ;;  %v2019_v2 = vld [vmem:[%s2004_s17 + $0x38] sm:$0xff]  ;;  %s1799_s23 = smov 127   ;;  %v2027_v4 = vld [vmem:[%s2004_s17 + $0x40] sm:$0xff]  ;;  %vm226_vm0 = vcmask 769024  }
  0x6e   : > { %1769 = vsyncadd (%p2334_p13), [#allocation8], 4294966400  ;;  %1455 = vmatprep.subr.bf16.mxu1 %v1798_v0  ;;  %251 = vrot.lane.b32.xlu1 %v2016_v1, %s1799_s23  ;;  %v2024_v3 = vld [vmem:[%s2004_s17 + $0x58] sm:$0xff]  ;;  %v2030_v5 = vld [vmem:[%s2004_s17 + $0x48] sm:$0xff]  ;;  %s1800_s26 = smov 126   ;;  %s1801_s5 = smov 112  }
  0x6f   : > { %245 = vrot.lane.b32.xlu0 %v2019_v2, %s1799_s23  ;;  %v2033_v6 = vld [vmem:[%s2004_s17 + $0x10] sm:$0xff]  ;;  %v2036_v7 = vld [vmem:[%s2004_s17 + $0x8] sm:$0xff]  ;;  %v317_v9 = vld [vmem:[%s2004_s17 + $0x20] sm:$0xff]  ;;  %s1802_s8 = smov 111   ;;  %s1803_s9 = smov 110   ;;  %vm618_vm1 = vcmask 130048  }
  0x70   : > { %v318_v8 = vld [vmem:[%s2004_s17 + $0x28] sm:$0xff]  ;;  %227 = vst.msk [vmem:[#allocation2 + $0x10] sm:$0xff] %vm226_vm0, %v2033_v6  ;;  %v2045_v10 = vld [vmem:[%s2004_s17 + $0x30] sm:$0xff]  ;;  %v316_v11 = vld [vmem:[%s2004_s17 + $0x18] sm:$0xff]  ;;  %v1419_v13 = vpack.c.bf16 %v317_v9, %v2036_v7  ;;  %s1804_s10 = smov 96   ;;  %s1805_s19 = smov 95  }
  0x71   : > { %v2049_v12 = vld [vmem:[%s2004_s17] sm:$0xff]  ;;  %230 = vst.msk [vmem:[#allocation2 + $0x28] sm:$0xff] %vm226_vm0, %v318_v8  ;;  %v2057_v15 = vld [vmem:[%s2004_s17 + $0x70] sm:$0xff]  ;;  %v2060_v16 = vld [vmem:[%s2004_s17 + $0x68] sm:$0xff]  ;;  %s1806_s20 = smov 94   ;;  %vm255_vm2 = vcmask 1039360  }
  0x72   : > { %253 = vrot.lane.b32.xlu1 %v2024_v3, %s1799_s23  ;;  %v1421_v14 = vpack.c.bf16 %v316_v11, %v2049_v12  ;;  %1420 = vmatprep.subr.bf16.mxu0 %v1419_v13  ;;  %v277_v19 = vld [vmem:[%s2004_s17 + $0x88] sm:$0xff]  ;;  %v276_v20 = vld [vmem:[%s2004_s17 + $0x80] sm:$0xff]  ;;  %v275_v22 = vld [vmem:[%s2004_s17 + $0x78] sm:$0xff]  ;;  %vm296_vm3 = vcmask 1031168   ;;  %vm337_vm4 = vcmask 916480   ;;  %vm378_vm5 = vcmask 908288  }
  0x73   : > { %247 = vrot.lane.b32.xlu0 %v2027_v4, %s1799_s23  ;;  %v2068_v23 = vld [vmem:[%s2004_s17 + $0x60] sm:$0xff]  ;;  %v559_v24 = vld [vmem:[#allocation7 + $0x8] sm:$0xff]  ;;  %vm419_vm6 = vcmask 900096   ;;  %vm460_vm7 = vcmask 785408   ;;  %vm501_vm8 = vcmask 777216   ;;  %s1807_s27 = smov 17  }
  0x74   : > { %1422 = vmatpush1.bf16.msra.mxu0 %v1421_v14  ;;  %1369 = vmatprep.mubr.msk.f32.mxu0 %vm618_vm1, %v559_v24  ;;  %s1808_s30 = smov 109   ;;  %vm821_vm9 = vcmask 138240   ;;  %s1809_s6 = smov 93   ;;  %vm1813_vm10 = vmmov 0   ;;  %vm858_vm11 = vcmask 490496   ;;  %vm886_vm12 = vcmask 891904  }
  0x75   : > { %1372 = vmatprep.mubr.msk.f32.mxu1 %vm618_vm1, %v559_v24  ;;  %s1810_s7 = smov 79   ;;  %s1811_s29 = smov 78   ;;  %vm929_vm13 = vcmask 760832   ;;  %vm944_vm14 = vcmask 646144   ;;  %vm959_vm15 = vcmask 637952  }
  0x76   : > { %249 = vrot.lane.b32.xlu1 %v2030_v5, %s1799_s23  ;;  %s1814_s28 = smov 77   ;;  %s1512_s22 = smul.u32 24, %s2000_s4 }
  0x77   : > { %243 = vrot.lane.b32.xlu0 %v2045_v10, %s1799_s23  ;;  %v566_v17 = vld [vmem:[#allocation2 + $0x10] sm:$0xff]  ;;  %s1387_s11 = smul.u32 384, %s1857_s16  ;;  %s1257_s16 = scalar_lea.sflag [#allocation6], %s2000_s4 }
  0x78   : > { %v569_v18 = vld [vmem:[#allocation2 + $0x28] sm:$0xff]  ;;  %p2335_p9 = scmp.ne.s32.totalorder %s2323_s24, 0 }
  0x79   : > { %v1456_v21 = vpack.c.bf16 %v569_v18, %v566_v17 }
  0x7a   : > { %288 = vrot.lane.b32.xlu1 %v2057_v15, %s1800_s26 }
  0x7b   : > { %286 = vrot.lane.b32.xlu0 %v2060_v16, %s1800_s26  ;;  %1457 = vmatpush1.bf16.msra.mxu1 %v1456_v21 }
  0x7c   : > { %1458 = vmatprep.subr.bf16.mxu1 %v1798_v0 }
  0x7e   : > { %294 = vrot.lane.b32.xlu1 %v277_v19, %s1800_s26 }
  0x7f   : > { %292 = vrot.lane.b32.xlu0 %v276_v20, %s1800_s26 }
  0x82   : > { %290 = vrot.lane.b32.xlu1 %v275_v22, %s1800_s26 }
  0x83   : > { %284 = vrot.lane.b32.xlu0 %v2068_v23, %s1800_s26 }
  0x86   : > { %329 = vrot.lane.b32.xlu1 %v2033_v6, %s1801_s5 }
  0x87   : > { %327 = vrot.lane.b32.xlu0 %v2036_v7, %s1801_s5 }
  0x8a   : > { %335 = vrot.lane.b32.xlu1 %v318_v8, %s1801_s5 }
  0x8b   : > { %333 = vrot.lane.b32.xlu0 %v317_v9, %s1801_s5 }
  0x8e   : > { %331 = vrot.lane.b32.xlu1 %v316_v11, %s1801_s5 }
  0x8f   : > { %325 = vrot.lane.b32.xlu0 %v2049_v12, %s1801_s5 }
  0x92   : > { %370 = vrot.lane.b32.xlu1 %v2027_v4, %s1802_s8 }
  0x93   : > { %368 = vrot.lane.b32.xlu0 %v2019_v2, %s1802_s8 }
  0x96   : > { %376 = vrot.lane.b32.xlu1 %v2024_v3, %s1802_s8 }
  0x97   : > { %374 = vrot.lane.b32.xlu0 %v2016_v1, %s1802_s8 }
  0x9a   : > { %372 = vrot.lane.b32.xlu1 %v2030_v5, %s1802_s8 }
  0x9b   : > { %366 = vrot.lane.b32.xlu0 %v2045_v10, %s1802_s8 }
  0x9e   : > { %411 = vrot.lane.b32.xlu1 %v2057_v15, %s1803_s9 }
  0x9f   : > { %409 = vrot.lane.b32.xlu0 %v2060_v16, %s1803_s9 }
  0xa2   : > { %417 = vrot.lane.b32.xlu1 %v277_v19, %s1803_s9 }
  0xa3   : > { %415 = vrot.lane.b32.xlu0 %v276_v20, %s1803_s9 }
  0xa6   : > { %413 = vrot.lane.b32.xlu1 %v275_v22, %s1803_s9 }
  0xa7   : > { %407 = vrot.lane.b32.xlu0 %v2068_v23, %s1803_s9 }
  0xaa   : > { %452 = vrot.lane.b32.xlu1 %v2033_v6, %s1804_s10 }
  0xab   : > { %450 = vrot.lane.b32.xlu0 %v2036_v7, %s1804_s10 }
  0xae   : > { %458 = vrot.lane.b32.xlu1 %v318_v8, %s1804_s10 }
  0xaf   : > { %456 = vrot.lane.b32.xlu0 %v317_v9, %s1804_s10 }
  0xb2   : > { %454 = vrot.lane.b32.xlu1 %v316_v11, %s1804_s10 }
  0xb3   : > { %448 = vrot.lane.b32.xlu0 %v2049_v12, %s1804_s10  ;;  %s1815_s10 = smov [#allocation10]  }
  0xb6   : > { %493 = vrot.lane.b32.xlu1 %v2027_v4, %s1805_s19 }
  0xb7   : > { %491 = vrot.lane.b32.xlu0 %v2019_v2, %s1805_s19 }
  0xba   : > { %499 = vrot.lane.b32.xlu1 %v2024_v3, %s1805_s19 }
  0xbb   : > { %497 = vrot.lane.b32.xlu0 %v2016_v1, %s1805_s19 }
  0xbe   : > { %495 = vrot.lane.b32.xlu1 %v2030_v5, %s1805_s19 }
  0xbf   : > { %489 = vrot.lane.b32.xlu0 %v2045_v10, %s1805_s19 }
  0xc2   : > { %534 = vrot.lane.b32.xlu1 %v2057_v15, %s1806_s20 }
  0xc3   : > { %532 = vrot.lane.b32.xlu0 %v2060_v16, %s1806_s20 }
  0xc6   : > { %540 = vrot.lane.b32.xlu1 %v277_v19, %s1806_s20 }
  0xc7   : > { %538 = vrot.lane.b32.xlu0 %v276_v20, %s1806_s20 }
  0xca   : > { %536 = vrot.lane.b32.xlu1 %v275_v22, %s1806_s20 }
  0xcb   : > { %530 = vrot.lane.b32.xlu0 %v2068_v23, %s1806_s20 }
  0xe0   : > { %v252_v25 = vpop.permute.xlu1 %251 }
  0xe1   : > { %v246_v26 = vpop.permute.xlu0 %245 }
  0xe4   : > { %v254_v27 = vpop.permute.xlu1 %253 }
  0xe5   : > { %v248_v28 = vpop.permute.xlu0 %247  ;;  %v259_v29 = vsel %vm255_vm2, %v252_v25, %v254_v27  ;;  %271 = vst.msk [vmem:[#allocation2 + $0x58] sm:$0xff] %vm226_vm0, %v254_v27 }
  0xe6   : > { %v257_v30 = vsel %vm255_vm2, %v246_v26, %v248_v28  ;;  %268 = vst.msk [vmem:[#allocation2 + $0x40] sm:$0xff] %vm226_vm0, %v248_v28 }
  0xe7   : > { %v1423_v31 = vpack.c.bf16 %v259_v29, %v257_v30 }
  0xe8   : > { %v250_v32 = vpop.permute.xlu1 %249 }
  0xe9   : > { %v244_v33 = vpop.permute.xlu0 %243  ;;  %1424 = vmatprep.subr.bf16.mxu0 %v1423_v31  ;;  %v258_v34 = vsel %vm255_vm2, %v250_v32, %v252_v25 }
  0xea   : > { %v256_v35 = vsel %vm255_vm2, %v244_v33, %v246_v26  ;;  %vm1011_vm2 = vcmask 588800  }
  0xeb   : > { %v1425_v36 = vpack.c.bf16 %v258_v34, %v256_v35 }
  0xec   : > { %v289_v37 = vpop.permute.xlu1 %288  ;;  %v575_v40 = vld [vmem:[#allocation2 + $0x58] sm:$0xff] }
  0xed   : > { %v287_v38 = vpop.permute.xlu0 %286  ;;  %v572_v39 = vld [vmem:[#allocation2 + $0x40] sm:$0xff]  ;;  %1426 = vmatpush1.bf16.msra.mxu0 %v1425_v36  ;;  %309 = vst.msk [vmem:[#allocation2 + $0x70] sm:$0xff] %vm226_vm0, %v289_v37 }
  0xee   : > { %v298_v41 = vsel %vm296_vm3, %v287_v38, %v289_v37  ;;  %v1459_v42 = vpack.c.bf16 %v575_v40, %v572_v39 }
  0xf0   : > { %1460 = vmatpush1.bf16.msra.mxu1 %v1459_v42  ;;  %v295_v43 = vpop.permute.xlu1 %294 }
  0xf1   : > { %v293_v44 = vpop.permute.xlu0 %292  ;;  %1461 = vmatprep.subr.bf16.mxu1 %v1798_v0  ;;  %312 = vst.msk [vmem:[#allocation2 + $0x88] sm:$0xff] %vm226_vm0, %v295_v43 }
  0xf2   : > { %v300_v45 = vsel %vm296_vm3, %v293_v44, %v295_v43 }
  0xf3   : > { %v1427_v46 = vpack.c.bf16 %v300_v45, %v298_v41 }
  0xf4   : > { %v291_v47 = vpop.permute.xlu1 %290  ;;  %v578_v54 = vld [vmem:[#allocation2 + $0x70] sm:$0xff] }
  0xf5   : > { %v285_v48 = vpop.permute.xlu0 %284  ;;  %1428 = vmatprep.subr.bf16.mxu0 %v1427_v46  ;;  %v299_v49 = vsel %vm296_vm3, %v291_v47, %v293_v44 }
  0xf6   : > { %v297_v50 = vsel %vm296_vm3, %v285_v48, %v287_v38  ;;  %vm1254_vm3 = vcmask 1048032  }
  0xf7   : > { %v1429_v51 = vpack.c.bf16 %v299_v49, %v297_v50 }
  0xf8   : > { %v330_v52 = vpop.permute.xlu1 %329  ;;  %v581_v55 = vld [vmem:[#allocation2 + $0x88] sm:$0xff] }
  0xf9   : > { %v328_v53 = vpop.permute.xlu0 %327  ;;  %1430 = vmatpush1.bf16.msra.mxu0 %v1429_v51  ;;  %350 = vst.msk [vmem:[#allocation2 + $0xa0] sm:$0xff] %vm226_vm0, %v330_v52  ;;  %v1462_v57 = vpack.c.bf16 %v581_v55, %v578_v54 }
  0xfa   : > { %v339_v56 = vsel %vm337_vm4, %v328_v53, %v330_v52 }
  0xfb   : > { %1463 = vmatpush1.bf16.msra.mxu1 %v1462_v57 }
  0xfc   : > { %v336_v58 = vpop.permute.xlu1 %335  ;;  %1464 = vmatprep.subr.bf16.mxu1 %v1798_v0 }
  0xfd   : > { %v334_v59 = vpop.permute.xlu0 %333  ;;  %353 = vst.msk [vmem:[#allocation2 + $0xb8] sm:$0xff] %vm226_vm0, %v336_v58 }
  0xfe   : > { %v341_v60 = vsel %vm337_vm4, %v334_v59, %v336_v58 }
  0xff   : > { %v1431_v61 = vpack.c.bf16 %v341_v60, %v339_v56 }
 0x100   : > { %v332_v62 = vpop.permute.xlu1 %331  ;;  %v584_v11 = vld [vmem:[#allocation2 + $0xa0] sm:$0xff] }
 0x101   : > { %v326_v63 = vpop.permute.xlu0 %325  ;;  %1432 = vmatprep.subr.bf16.mxu0 %v1431_v61  ;;  %v340_v1 = vsel %vm337_vm4, %v332_v62, %v334_v59 }
 0x102   : > { %v338_v3 = vsel %vm337_vm4, %v326_v63, %v328_v53 }
 0x103   : > { %v1433_v5 = vpack.c.bf16 %v340_v1, %v338_v3 }
 0x104   : > { %v371_v8 = vpop.permute.xlu1 %370  ;;  %v587_v13 = vld [vmem:[#allocation2 + $0xb8] sm:$0xff] }
 0x105   : > { %v369_v9 = vpop.permute.xlu0 %368  ;;  %1434 = vmatpush1.bf16.msra.mxu0 %v1433_v5  ;;  %391 = vst.msk [vmem:[#allocation2 + $0xd0] sm:$0xff] %vm226_vm0, %v371_v8  ;;  %v1465_v17 = vpack.c.bf16 %v587_v13, %v584_v11 }
 0x106   : > { %v380_v14 = vsel %vm378_vm5, %v369_v9, %v371_v8 }
 0x107   : > { %1466 = vmatpush1.bf16.msra.mxu1 %v1465_v17 }
 0x108   : > { %v377_v18 = vpop.permute.xlu1 %376  ;;  %1467 = vmatprep.subr.bf16.mxu1 %v1798_v0 }
 0x109   : > { %v375_v19 = vpop.permute.xlu0 %374  ;;  %394 = vst.msk [vmem:[#allocation2 + $0xe8] sm:$0xff] %vm226_vm0, %v377_v18 }
 0x10a   : > { %v382_v20 = vsel %vm378_vm5, %v375_v19, %v377_v18 }
 0x10b   : > { %v1435_v21 = vpack.c.bf16 %v382_v20, %v380_v14 }
 0x10c   : > { %v373_v22 = vpop.permute.xlu1 %372  ;;  %v590_v30 = vld [vmem:[#allocation2 + $0xd0] sm:$0xff] }
 0x10d   : > { %v367_v24 = vpop.permute.xlu0 %366  ;;  %1436 = vmatprep.subr.bf16.mxu0 %v1435_v21  ;;  %v381_v25 = vsel %vm378_vm5, %v373_v22, %v375_v19 }
 0x10e   : > { %v379_v26 = vsel %vm378_vm5, %v367_v24, %v369_v9 }
 0x10f   : > { %v1437_v27 = vpack.c.bf16 %v381_v25, %v379_v26 }
 0x110   : > { %v412_v28 = vpop.permute.xlu1 %411  ;;  %v593_v31 = vld [vmem:[#allocation2 + $0xe8] sm:$0xff] }
 0x111   : > { %v410_v29 = vpop.permute.xlu0 %409  ;;  %1438 = vmatpush1.bf16.msra.mxu0 %v1437_v27  ;;  %432 = vst.msk [vmem:[#allocation2 + $0x100] sm:$0xff] %vm226_vm0, %v412_v28  ;;  %v1468_v33 = vpack.c.bf16 %v593_v31, %v590_v30 }
 0x112   : > { %v421_v32 = vsel %vm419_vm6, %v410_v29, %v412_v28 }
 0x113   : > { %1469 = vmatpush1.bf16.msra.mxu1 %v1468_v33 }
 0x114   : > { %v418_v34 = vpop.permute.xlu1 %417  ;;  %1470 = vmatprep.subr.bf16.mxu1 %v1798_v0 }
 0x115   : > { %v416_v35 = vpop.permute.xlu0 %415  ;;  %435 = vst.msk [vmem:[#allocation2 + $0x118] sm:$0xff] %vm226_vm0, %v418_v34 }
 0x116   : > { %v423_v36 = vsel %vm419_vm6, %v416_v35, %v418_v34 }
 0x117   : > { %v1439_v37 = vpack.c.bf16 %v423_v36, %v421_v32  ;;  %v558_v36 = vld [vmem:[#allocation7] sm:$0xff] }
 0x118   : > { %v414_v38 = vpop.permute.xlu1 %413  ;;  %v596_v45 = vld [vmem:[#allocation2 + $0x100] sm:$0xff] }
 0x119   : > { %v408_v39 = vpop.permute.xlu0 %407  ;;  %1440 = vmatprep.subr.bf16.mxu0 %v1439_v37  ;;  %v422_v40 = vsel %vm419_vm6, %v414_v38, %v416_v35  ;;  %v561_v38 = vld [vmem:[#allocation7 + $0x18] sm:$0xff] }
 0x11a   : > { %v420_v41 = vsel %vm419_vm6, %v408_v39, %v410_v29  ;;  %v560_v39 = vld [vmem:[#allocation7 + $0x10] sm:$0xff] }
 0x11b   : > { %v1441_v42 = vpack.c.bf16 %v422_v40, %v420_v41 }
 0x11c   : > { %v453_v43 = vpop.permute.xlu1 %452  ;;  %v599_v46 = vld [vmem:[#allocation2 + $0x118] sm:$0xff] }
 0x11d   : > { %v451_v44 = vpop.permute.xlu0 %450  ;;  %1442 = vmatpush1.bf16.msra.mxu0 %v1441_v42  ;;  %473 = vst.msk [vmem:[#allocation2 + $0x130] sm:$0xff] %vm226_vm0, %v453_v43  ;;  %v1471_v48 = vpack.c.bf16 %v599_v46, %v596_v45 }
 0x11e   : > { %v462_v47 = vsel %vm460_vm7, %v451_v44, %v453_v43 }
 0x11f   : > { %1472 = vmatpush1.bf16.msra.mxu1 %v1471_v48 }
 0x120   : > { %v459_v49 = vpop.permute.xlu1 %458  ;;  %1473 = vmatprep.subr.bf16.mxu1 %v1798_v0 }
 0x121   : > { %v457_v50 = vpop.permute.xlu0 %456  ;;  %476 = vst.msk [vmem:[#allocation2 + $0x148] sm:$0xff] %vm226_vm0, %v459_v49 }
 0x122   : > { %v464_v51 = vsel %vm460_vm7, %v457_v50, %v459_v49 }
 0x123   : > { %v1443_v52 = vpack.c.bf16 %v464_v51, %v462_v47 }
 0x124   : > { %v455_v53 = vpop.permute.xlu1 %454  ;;  %v602_v60 = vld [vmem:[#allocation2 + $0x130] sm:$0xff] }
 0x125   : > { %v449_v54 = vpop.permute.xlu0 %448  ;;  %1444 = vmatprep.subr.bf16.mxu0 %v1443_v52  ;;  %v463_v55 = vsel %vm460_vm7, %v455_v53, %v457_v50 }
 0x126   : > { %v461_v56 = vsel %vm460_vm7, %v449_v54, %v451_v44 }
 0x127   : > { %v1445_v57 = vpack.c.bf16 %v463_v55, %v461_v56 }
 0x128   : > { %v494_v58 = vpop.permute.xlu1 %493  ;;  %v605_v61 = vld [vmem:[#allocation2 + $0x148] sm:$0xff] }
 0x129   : > { %v492_v59 = vpop.permute.xlu0 %491  ;;  %1446 = vmatpush1.bf16.msra.mxu0 %v1445_v57  ;;  %514 = vst.msk [vmem:[#allocation2 + $0x160] sm:$0xff] %vm226_vm0, %v494_v58  ;;  %v1474_v63 = vpack.c.bf16 %v605_v61, %v602_v60 }
 0x12a   : > { %v503_v62 = vsel %vm501_vm8, %v492_v59, %v494_v58 }
 0x12b   : > { %1475 = vmatpush1.bf16.msra.mxu1 %v1474_v63 }
 0x12c   : > { %v500_v1 = vpop.permute.xlu1 %499  ;;  %1476 = vmatprep.subr.bf16.mxu1 %v1798_v0 }
 0x12d   : > { %v498_v3 = vpop.permute.xlu0 %497  ;;  %517 = vst.msk [vmem:[#allocation2 + $0x178] sm:$0xff] %vm226_vm0, %v500_v1 }
 0x12e   : > { %v505_v5 = vsel %vm501_vm8, %v498_v3, %v500_v1 }
 0x12f   : > { %v1447_v8 = vpack.c.bf16 %v505_v5, %v503_v62 }
 0x130   : > { %v496_v9 = vpop.permute.xlu1 %495  ;;  %v608_v20 = vld [vmem:[#allocation2 + $0x160] sm:$0xff] }
 0x131   : > { %v490_v11 = vpop.permute.xlu0 %489  ;;  %1448 = vmatprep.subr.bf16.mxu0 %v1447_v8  ;;  %v504_v13 = vsel %vm501_vm8, %v496_v9, %v498_v3 }
 0x132   : > { %v502_v14 = vsel %vm501_vm8, %v490_v11, %v492_v59 }
 0x133   : > { %v1449_v17 = vpack.c.bf16 %v504_v13, %v502_v14 }
 0x134   : > { %v535_v18 = vpop.permute.xlu1 %534  ;;  %v611_v21 = vld [vmem:[#allocation2 + $0x178] sm:$0xff] }
 0x135   : > { %v533_v19 = vpop.permute.xlu0 %532  ;;  %1450 = vmatpush1.bf16.msra.mxu0 %v1449_v17  ;;  %554 = vst.msk [vmem:[#allocation2 + $0x190] sm:$0xff] %vm226_vm0, %v535_v18  ;;  %v1477_v24 = vpack.c.bf16 %v611_v21, %v608_v20 }
 0x136   : > { %v543_v22 = vsel %vm226_vm0, %v533_v19, %v535_v18 }
 0x137   : > { %1478 = vmatpush1.bf16.msra.mxu1 %v1477_v24 }
 0x138   : > { %v541_v25 = vpop.permute.xlu1 %540  ;;  %1479 = vmatprep.subr.bf16.mxu1 %v1798_v0 }
 0x139   : > { %v539_v26 = vpop.permute.xlu0 %538  ;;  %557 = vst.msk [vmem:[#allocation2 + $0x1a8] sm:$0xff] %vm226_vm0, %v541_v25 }
 0x13a   : > { %v545_v27 = vsel %vm226_vm0, %v539_v26, %v541_v25 }
 0x13b   : > { %v1451_v28 = vpack.c.bf16 %v545_v27, %v543_v22 }
 0x13c   : > { %v537_v29 = vpop.permute.xlu1 %536  ;;  %v614_v34 = vld [vmem:[#allocation2 + $0x190] sm:$0xff] }
 0x13d   : > { %v531_v30 = vpop.permute.xlu0 %530  ;;  %1452 = vmatprep.subr.bf16.mxu0 %v1451_v28  ;;  %v544_v31 = vsel %vm226_vm0, %v537_v29, %v539_v26 }
 0x13e   : > { %v542_v32 = vsel %vm226_vm0, %v531_v30, %v533_v19 }
 0x13f   : > { %v1453_v33 = vpack.c.bf16 %v544_v31, %v542_v32 }
 0x140   : > { %v617_v35 = vld [vmem:[#allocation2 + $0x1a8] sm:$0xff] }
 0x141   : > { %1454 = vmatpush1.bf16.msra.mxu0 %v1453_v33  ;;  %v1480_v37 = vpack.c.bf16 %v617_v35, %v614_v34 }
 0x143   : > { %1481 = vmatpush1.bf16.msra.mxu1 %v1480_v37 }
 0x144   : > { %693 = vmatmul.mubr.f32.vlgmr.msra.gmra.mrb[0].mxu0 %v558_v36  ;;  %1498 = vmatprep.subr.bf16.mxu1 %v1798_v0 }
 0x145   : > { %1370 = vmatprep.mubr.msk.f32.mxu0 %vm618_vm1, %v561_v38 }
 0x146   : > { %776 = vmatmul.mubr.f32.vlgmr.msra.gmra.mrb[0].mxu1 %v558_v36 }
 0x147   : > { %1373 = vmatprep.mubr.msk.f32.mxu1 %vm618_vm1, %v561_v38 }
 0x148   : > { %699 = vmatmul.mubr.f32.gmra.mrb[2].mxu0 %v560_v39 }
 0x14a   : > { %781 = vmatmul.mubr.f32.gmra.mrb[2].mxu1 %v560_v39 }
 0x217   : > { %v2176_v40 = vpop.f32.mrb[0].mxu0 }
 0x218   : > { %v2178_v41 = vpop.f32.mrb[1].mxu0 }
 0x219   : > { %v2180_v42 = vpop.f32.mrb[0].mxu1 }
 0x21a   : > { %v779_v44 = vpop.f32.mrb[1].mxu1 }
 0x21b   : > { %v700_v43 = vpop.f32.mrb[2].mxu0 }
 0x21c   : > { %v1375_v45 = vmul.f32 -1.442695, %v700_v43  ;;  %v702_v46 = vpop.f32.mrb[3].mxu0 }
 0x21d   : > { %v1376_v47 = vmul.f32 -1.442695, %v702_v46  ;;  %v782_v48 = vpop.f32.mrb[2].mxu1 }
 0x21e   : > { %1602 = vpow2.f32 %v1375_v45  ;;  %v1377_v49 = vmul.f32 -1.442695, %v782_v48  ;;  %v784_v50 = vpop.f32.mrb[3].mxu1 }
 0x21f   : > { %1604 = vpow2.f32 %v1376_v47 }
 0x220   : > { %1606 = vpow2.f32 %v1377_v49 }
 0x228   : > { %v1603_v51 = vpop.eup %1602 }
 0x229   : > { %v1605_v52 = vpop.eup %1604  ;;  %v800_v53 = vadd.f32 1.0, %v1603_v51 }
 0x22a   : > { %v801_v54 = vadd.f32 1.0, %v1605_v52  ;;  %v1607_v55 = vpop.eup %1606 }
 0x22b   : > { %1608 = vrcp.f32 %v800_v53  ;;  %v802_v56 = vadd.f32 1.0, %v1607_v55 }
 0x22c   : > { %1610 = vrcp.f32 %v801_v54 }
 0x22d   : > { %1612 = vrcp.f32 %v802_v56 }
 0x235   : > { %v1609_v57 = vpop.eup %1608 }
 0x236   : > { %v1611_v58 = vpop.eup %1610  ;;  %815 = vrot.lane.b32.xlu0 %v1609_v57, %s1807_s27 }
 0x237   : > { %817 = vrot.lane.b32.xlu1 %v1611_v58, %s1807_s27  ;;  %v1613_v59 = vpop.eup %1612 }
 0x23a   : > { %819 = vrot.lane.b32.xlu0 %v1613_v59, %s1807_s27 }
 0x2a8   : > { %v816_v60 = vpop.permute.xlu0 %815 }
 0x2a9   : > { %v833_v61 = vmul.f32 %v816_v60, %v2045_v10  ;;  %v827_v62 = vmul.f32 %v816_v60, %v2049_v12  ;;  %v839_v63 = vmul.f32 %v816_v60, %v2068_v23  ;;  %v818_v3 = vpop.permute.xlu1 %817 }
 0x2aa   : > { %v822_v12 = vsel %vm821_vm9, %v816_v60, %v818_v3 }
 0x2ab   : > { %863 = vrot.lane.b32.xlu0 %v833_v61, %s1803_s9  ;;  %845 = vrot.lane.b32.xlu1 %v827_v62, %s1802_s8  ;;  %v828_v8 = vmul.f32 %v822_v12, %v2036_v7  ;;  %v834_v11 = vmul.f32 %v822_v12, %v2019_v2  ;;  %v562_v7 = vld [vmem:[#allocation7 + $0x20] sm:$0xff]  ;;  %v1812_v2 = vmov 0.0  }
 0x2ac   : > { %v820_v1 = vpop.permute.xlu0 %819 }
 0x2ad   : > { %v823_v5 = vsel %vm821_vm9, %v818_v3, %v820_v1 }
 0x2ae   : > { %v829_v10 = vmul.f32 %v823_v5, %v2033_v6  ;;  %v835_v23 = vmul.f32 %v823_v5, %v2027_v4  ;;  %v841_v9 = vmul.f32 %v823_v5, %v2057_v15  ;;  %v840_v6 = vmul.f32 %v822_v12, %v2060_v16  ;;  %v563_v4 = vld [vmem:[#allocation7 + $0x28] sm:$0xff] }
 0x2af   : > { %895 = vrot.lane.b32.xlu0 %v827_v62, %s1805_s19  ;;  %880 = vrot.lane.b32.xlu1 %v839_v63, %s1808_s30 }
 0x2b0   : > { %1371 = vmatprep.mubr.msk.f32.mxu0 %vm618_vm1, %v563_v4  ;;  %1374 = vmatprep.mubr.msk.f32.mxu1 %vm618_vm1, %v563_v4  ;;  %vm974_vm1 = vcmask 629760  }
 0x2b1   : > { %705 = vmatmul.mubr.f32.gmra.mrb[4].mxu0 %v562_v7  ;;  %786 = vmatmul.mubr.f32.gmra.mrb[4].mxu1 %v562_v7 }
 0x2b2   : > { %1079 = vmatprep.mubr.f32.mxu0 %v1812_v2  ;;  %1416 = vmatprep.mubr.msk.f32.mxu1 %vm1813_vm10, %v1812_v2 }
 0x2b3   : > { %923 = vrot.lane.b32.xlu0 %v839_v63, %s1809_s6  ;;  %909 = vrot.lane.b32.xlu1 %v833_v61, %s1806_s20 }
 0x2b7   : > { %938 = vrot.lane.b32.xlu1 %v827_v62, %s1810_s7  ;;  %849 = vrot.lane.b32.xlu0 %v829_v10, %s1802_s8 }
 0x2bb   : > { %867 = vrot.lane.b32.xlu0 %v835_v23, %s1803_s9  ;;  %847 = vrot.lane.b32.xlu1 %v828_v8, %s1802_s8  ;;  %s2265_s8 = scalar_lea.hbm %s2315_s3, %s1387_s11 }
 0x2bf   : > { %884 = vrot.lane.b32.xlu0 %v841_v9, %s1808_s30  ;;  %865 = vrot.lane.b32.xlu1 %v834_v11, %s1803_s9 }
 0x2c3   : > { %899 = vrot.lane.b32.xlu0 %v829_v10, %s1805_s19  ;;  %882 = vrot.lane.b32.xlu1 %v840_v6, %s1808_s30 }
 0x2c7   : > { %913 = vrot.lane.b32.xlu0 %v835_v23, %s1806_s20  ;;  %897 = vrot.lane.b32.xlu1 %v828_v8, %s1805_s19  ;;  %s1722_s19 = sshll.u32 %s1815_s10, 4  ;;  %s1723_s19 = int_to_ptr.vmem [resolvable:$false] %s1722_s19 }
 0x2cb   : > { %927 = vrot.lane.b32.xlu0 %v841_v9, %s1809_s6  ;;  %911 = vrot.lane.b32.xlu1 %v834_v11, %s1806_s20 }
 0x2cf   : > { %942 = vrot.lane.b32.xlu0 %v829_v10, %s1810_s7  ;;  %925 = vrot.lane.b32.xlu1 %v840_v6, %s1809_s6 }
 0x2d3   : > { %957 = vrot.lane.b32.xlu0 %v835_v23, %s1811_s29  ;;  %940 = vrot.lane.b32.xlu1 %v828_v8, %s1810_s7 }
 0x2d7   : > { %953 = vrot.lane.b32.xlu0 %v833_v61, %s1811_s29  ;;  %955 = vrot.lane.b32.xlu1 %v834_v11, %s1811_s29 }
 0x2db   : > { %972 = vrot.lane.b32.xlu0 %v841_v9, %s1814_s28  ;;  %970 = vrot.lane.b32.xlu1 %v840_v6, %s1814_s28 }
 0x2df   : > { %968 = vrot.lane.b32.xlu1 %v839_v63, %s1814_s28 }
 0x31d   : > { %v864_v15 = vpop.permute.xlu0 %863  ;;  %v846_v16 = vpop.permute.xlu1 %845 }
 0x321   : > { %v896_v13 = vpop.permute.xlu0 %895  ;;  %v881_v14 = vpop.permute.xlu1 %880 }
 0x325   : > { %v924_v17 = vpop.permute.xlu0 %923  ;;  %v910_v18 = vpop.permute.xlu1 %909 }
 0x329   : > { %v850_v19 = vpop.permute.xlu0 %849  ;;  %v939_v20 = vpop.permute.xlu1 %938 }
 0x32a   : > { %859 = vst.msk [vmem:[#allocation3 + $0x10] sm:$0xff] %vm858_vm11, %v850_v19 }
 0x32d   : > { %v868_v21 = vpop.permute.xlu0 %867  ;;  %v848_v22 = vpop.permute.xlu1 %847 }
 0x32e   : > { %876 = vst.msk [vmem:[#allocation3 + $0x28] sm:$0xff] %vm858_vm11, %v868_v21  ;;  %v851_v24 = vsel %vm378_vm5, %v846_v16, %v848_v22  ;;  %v852_v25 = vsel %vm378_vm5, %v848_v22, %v850_v19 }
 0x331   : > { %v885_v26 = vpop.permute.xlu0 %884  ;;  %v866_v27 = vpop.permute.xlu1 %865  ;;  %v986_v34 = vld [vmem:[#allocation3 + $0x10] sm:$0xff] }
 0x332   : > { %894 = vst.msk [vmem:[#allocation3 + $0x40] sm:$0xff] %vm858_vm11, %v885_v26  ;;  %v869_v28 = vsel %vm419_vm6, %v864_v15, %v866_v27  ;;  %v870_v29 = vsel %vm419_vm6, %v866_v27, %v868_v21  ;;  %v1382_v27 = vmul.f32 -1.442695, %v2180_v42 }
 0x333   : > { %v1482_v30 = vpack.c.bf16 %v870_v29, %v852_v25  ;;  %v1484_v31 = vpack.c.bf16 %v869_v28, %v851_v24  ;;  %v1380_v25 = vmul.f32 -1.442695, %v2176_v40 }
 0x335   : > { %v900_v32 = vpop.permute.xlu0 %899  ;;  %v883_v33 = vpop.permute.xlu1 %882  ;;  %v989_v35 = vld [vmem:[#allocation3 + $0x28] sm:$0xff]  ;;  %1483 = vmatprep.subr.bf16.mxu0 %v1482_v30  ;;  %1614 = vpow2.f32 %v1380_v25 }
 0x336   : > { %908 = vst.msk [vmem:[#allocation3 + $0x58] sm:$0xff] %vm858_vm11, %v900_v32  ;;  %v887_v36 = vsel %vm886_vm12, %v881_v14, %v883_v33  ;;  %v888_v37 = vsel %vm886_vm12, %v883_v33, %v885_v26  ;;  %v1499_v38 = vpack.c.bf16 %v989_v35, %v986_v34  ;;  %1485 = vmatpush1.bf16.msra.mxu0 %v1484_v31  ;;  %v1381_v26 = vmul.f32 -1.442695, %v2178_v41 }
 0x338   : > { %1500 = vmatpush3.bf16.msra.mxu1 %v1499_v38  ;;  %1616 = vpow2.f32 %v1381_v26 }
 0x339   : > { %v914_v39 = vpop.permute.xlu0 %913  ;;  %v898_v43 = vpop.permute.xlu1 %897  ;;  %1501 = vmatprep.subr.bf16.mxu1 %v1798_v0  ;;  %v992_v50 = vld [vmem:[#allocation3 + $0x40] sm:$0xff]  ;;  %1618 = vpow2.f32 %v1382_v27 }
 0x33a   : > { %922 = vst.msk [vmem:[#allocation3 + $0x70] sm:$0xff] %vm858_vm11, %v914_v39  ;;  %v901_v44 = vsel %vm501_vm8, %v896_v13, %v898_v43  ;;  %v902_v45 = vsel %vm501_vm8, %v898_v43, %v900_v32 }
 0x33b   : > { %v1486_v46 = vpack.c.bf16 %v902_v45, %v888_v37  ;;  %v1488_v47 = vpack.c.bf16 %v901_v44, %v887_v36 }
 0x33d   : > { %v928_v48 = vpop.permute.xlu0 %927  ;;  %v912_v49 = vpop.permute.xlu1 %911  ;;  %v995_v51 = vld [vmem:[#allocation3 + $0x58] sm:$0xff]  ;;  %1487 = vmatprep.subr.bf16.mxu0 %v1486_v46 }
 0x33e   : > { %937 = vst.msk [vmem:[#allocation3 + $0x88] sm:$0xff] %vm858_vm11, %v928_v48  ;;  %v915_v52 = vsel %vm226_vm0, %v910_v18, %v912_v49  ;;  %v916_v53 = vsel %vm226_vm0, %v912_v49, %v914_v39  ;;  %v1502_v54 = vpack.c.bf16 %v995_v51, %v992_v50  ;;  %1489 = vmatpush1.bf16.msra.mxu0 %v1488_v47 }
 0x33f   : > { %v1615_v28 = vpop.eup %1614 }
 0x340   : > { %1503 = vmatpush3.bf16.msra.mxu1 %v1502_v54  ;;  %v1165_v30 = vadd.f32 1.0, %v1615_v28 }
 0x341   : > { %v943_v55 = vpop.permute.xlu0 %942  ;;  %v926_v56 = vpop.permute.xlu1 %925  ;;  %1504 = vmatprep.subr.bf16.mxu1 %v1798_v0  ;;  %v998_v63 = vld [vmem:[#allocation3 + $0x70] sm:$0xff] }
 0x342   : > { %952 = vst.msk [vmem:[#allocation3 + $0xa0] sm:$0xff] %vm858_vm11, %v943_v55  ;;  %v930_v57 = vsel %vm929_vm13, %v924_v17, %v926_v56  ;;  %v931_v58 = vsel %vm929_vm13, %v926_v56, %v928_v48  ;;  %v1617_v29 = vpop.eup %1616  ;;  %1620 = vrcp.f32 %v1165_v30 }
 0x343   : > { %v1490_v59 = vpack.c.bf16 %v931_v58, %v916_v53  ;;  %v1492_v60 = vpack.c.bf16 %v930_v57, %v915_v52  ;;  %v1619_v31 = vpop.eup %1618  ;;  %v1166_v32 = vadd.f32 1.0, %v1617_v29 }
 0x344   : > { %v1167_v33 = vadd.f32 1.0, %v1619_v31 }
 0x345   : > { %v958_v61 = vpop.permute.xlu0 %957  ;;  %v941_v62 = vpop.permute.xlu1 %940  ;;  %v1001_v1 = vld [vmem:[#allocation3 + $0x88] sm:$0xff]  ;;  %1491 = vmatprep.subr.bf16.mxu0 %v1490_v59  ;;  %1622 = vrcp.f32 %v1166_v32 }
 0x346   : > { %967 = vst.msk [vmem:[#allocation3 + $0xb8] sm:$0xff] %vm858_vm11, %v958_v61  ;;  %v945_v3 = vsel %vm944_vm14, %v939_v20, %v941_v62  ;;  %v946_v5 = vsel %vm944_vm14, %v941_v62, %v943_v55  ;;  %v1505_v10 = vpack.c.bf16 %v1001_v1, %v998_v63  ;;  %1493 = vmatpush1.bf16.msra.mxu0 %v1492_v60  ;;  %1624 = vrcp.f32 %v1167_v33  ;;  %v1194_v59 = vld [vmem:[%s2004_s17 + $0x30] sm:$0xff]  ;;  %v1195_v63 = vld [vmem:[%s2004_s17 + $0x38] sm:$0xff] }
 0x348   : > { %1506 = vmatpush3.bf16.msra.mxu1 %v1505_v10 }
 0x349   : > { %v954_v12 = vpop.permute.xlu0 %953  ;;  %v956_v23 = vpop.permute.xlu1 %955  ;;  %1507 = vmatprep.subr.bf16.mxu1 %v1798_v0  ;;  %v1004_v15 = vld [vmem:[#allocation3 + $0xa0] sm:$0xff]  ;;  %v983_v0 = vld [vmem:[#allocation9] sm:$0xff] }
 0x34a   : > { %v960_v8 = vsel %vm959_vm15, %v954_v12, %v956_v23  ;;  %v961_v9 = vsel %vm959_vm15, %v956_v23, %v958_v61  ;;  %v1196_v12 = vld [vmem:[%s2004_s17 + $0x40] sm:$0xff]  ;;  %s215_s17 = scalar_lea.vmem [#allocation10], %s1512_s22 }
 0x34b   : > { %v1494_v11 = vpack.c.bf16 %v961_v9, %v946_v5  ;;  %v1496_v6 = vpack.c.bf16 %v960_v8, %v945_v3  ;;  %s1271_s23 = sshll.u32 %s215_s17, 4  ;;  %s2267_s23 = int_to_ptr.vmem [resolvable:$true] %s1271_s23 }
 0x34c   : > { %v1621_v35 = vpop.eup %1620  ;;  %s1718_s9 = scalar_lea.vmem %s2267_s23, 384  ;;  %p1725_p0 = scmp.lt.s32.totalorder %s2267_s23, %s1723_s19 }
 0x34d   : > { %v973_v4 = vpop.permute.xlu0 %972  ;;  %v971_v7 = vpop.permute.xlu1 %970  ;;  %v1007_v16 = vld [vmem:[#allocation3 + $0xb8] sm:$0xff]  ;;  %1495 = vmatprep.subr.bf16.mxu0 %v1494_v11  ;;  %v1197_v37 = vsub.f32 1.0, %v1621_v35  ;;  %p1719_p3 = scmp.ne.s32.totalorder %s2267_s23, %s1718_s9 }
 0x34e   : > { %982 = vst.msk [vmem:[#allocation3 + $0xd0] sm:$0xff] %vm858_vm11, %v973_v4  ;;  %v976_v13 = vsel %vm974_vm1, %v971_v7, %v973_v4  ;;  %v1508_v14 = vpack.c.bf16 %v1007_v16, %v1004_v15  ;;  %1497 = vmatpush1.bf16.msra.mxu0 %v1496_v6 }
 0x34f   : > { %1031 = vmatprep.subr.mxu0 %v976_v13  ;;  %v1623_v42 = vpop.eup %1622  ;;  %p1720_p10 = pnand %p1719_p3, %p2335_p9 }
 0x350   : > { %1509 = vmatpush3.bf16.msra.mxu1 %v1508_v14  ;;  %v1625_v38 = vpop.eup %1624  ;;  %v1198_v39 = vsub.f32 1.0, %v1623_v42 }
 0x351   : > { %v969_v17 = vpop.permute.xlu1 %968  ;;  %1414 = vmatprep.subr.mxu1 %v1812_v2  ;;  %v1199_v43 = vsub.f32 1.0, %v1625_v38  ;;  %p1721_p1 = pneg %p1720_p10 }
 0x352   : > { %v975_v18 = vsel %vm974_vm1, %v969_v17, %v971_v7 }
 0x353   : > { %1032 = vmatpush1.msra.mxu0 %v975_v18 }
 0x354   : > { %1378 = vmatmul.mubr.msk.f32.vlgmr.msra.gmra.mrb[6].mxu0 %vm1011_vm2, %v983_v0 }
 0x355   : > { %v1010_v19 = vld [vmem:[#allocation3 + $0xd0] sm:$0xff] }
 0x356   : > { %1415 = vmatpush3.msra.mxu1 %v1010_v19 }
 0x357   : > { %1417 = vmatmul.mubr.msk.f32.vlgmr.msra.gmra.mrb[6].mxu1 %vm1011_vm2, %v983_v0 }
 0x384   : > { %v706_v20 = vpop.f32.mrb[4].mxu0  ;;  %v787_v21 = vpop.f32.mrb[4].mxu1 }
 0x385   : > { %v708_v22 = vpop.f32.mrb[5].mxu0  ;;  %v789_v24 = vpop.f32.mrb[5].mxu1 }
 0x427   : > { %v1081_v34 = vpop.f32.mrb[6].mxu0 }
 0x428   : > { %1177 = vrot.lane.b32.xlu0 %v1081_v34, %s1807_s27  ;;  %v1083_v40 = vpop.f32.mrb[7].mxu0 }
 0x429   : > { %1179 = vrot.lane.b32.xlu1 %v1083_v40, %s1807_s27 }
 0x42a   : > { %v1152_v41 = vpop.f32.mrb[6].mxu1 }
 0x42b   : > { %v1418_v36 = vpop.f32.mrb[7].mxu1 }
 0x42c   : > { %1181 = vrot.lane.b32.xlu0 %v1152_v41, %s1807_s27 }
 0x42d   : > { %1203 = vrot.lane.b32.xlu1 %v1197_v37, %s1807_s27 }
 0x430   : > { %1205 = vrot.lane.b32.xlu0 %v1198_v39, %s1807_s27 }
 0x431   : > { %1207 = vrot.lane.b32.xlu1 %v1199_v43, %s1807_s27 }
 0x49a   : > { %v1178_v44 = vpop.permute.xlu0 %1177 }
 0x49b   : > { %v1188_v45 = vadd.f32 %v1178_v44, %v706_v20  ;;  %v1180_v46 = vpop.permute.xlu1 %1179 }
 0x49c   : > { %v1183_v47 = vsel %vm821_vm9, %v1178_v44, %v1180_v46 }
 0x49d   : > { %1626 = vtanh.f32 %v1188_v45  ;;  %v1189_v48 = vadd.f32 %v1183_v47, %v708_v22 }
 0x49e   : > { %v1182_v49 = vpop.permute.xlu0 %1181 }
 0x49f   : > { %1628 = vtanh.f32 %v1189_v48  ;;  %v1184_v50 = vsel %vm821_vm9, %v1180_v46, %v1182_v49  ;;  %v1204_v58 = vpop.permute.xlu1 %1203 }
 0x4a0   : > { %v1190_v51 = vadd.f32 %v1184_v50, %v787_v21  ;;  %v1214_v62 = vmul.f32 %v1204_v58, %v1194_v59 }
 0x4a2   : > { %1630 = vtanh.f32 %v1190_v51  ;;  %v1206_v60 = vpop.permute.xlu0 %1205 }
 0x4a3   : > { %v1208_v61 = vpop.permute.xlu1 %1207  ;;  %v1209_v1 = vsel %vm821_vm9, %v1204_v58, %v1206_v60 }
 0x4a4   : > { %v1215_v10 = vmul.f32 %v1209_v1, %v1195_v63  ;;  %v1210_v23 = vsel %vm821_vm9, %v1206_v60, %v1208_v61 }
 0x4a5   : > { %v1216_v6 = vmul.f32 %v1210_v23, %v1196_v12 }
 0x4a7   : > { %v1627_v52 = vpop.eup %1626 }
 0x4a8   : > { %v1217_v53 = vmul.f32 %v1627_v52, %v1621_v35 }
 0x4a9   : > { %v1629_v54 = vpop.eup %1628 }
 0x4aa   : > { %1223 = vrot.lane.b32.xlu0 %v1217_v53, %s1807_s27  ;;  %v1218_v55 = vmul.f32 %v1629_v54, %v1623_v42 }
 0x4ac   : > { %v1631_v56 = vpop.eup %1630  ;;  %1225 = vrot.lane.b32.xlu1 %v1218_v55, %s1807_s27 }
 0x4ad   : > { %v1219_v57 = vmul.f32 %v1631_v56, %v1625_v38 }
 0x4af   : > { %1227 = vrot.lane.b32.xlu0 %v1219_v57, %s1807_s27 }
 0x51c   : > { %v1224_v3 = vpop.permute.xlu0 %1223 }
 0x51d   : > { %v1234_v5 = vadd.f32 %v1224_v3, %v1214_v62 }
 0x51e   : > { %v1226_v8 = vpop.permute.xlu1 %1225 }
 0x51f   : > { %v1229_v9 = vsel %vm821_vm9, %v1224_v3, %v1226_v8  ;;  %1240 = vrot.lane.b32.xlu1 %v1234_v5, %s1806_s20 }
 0x520   : > { %v1235_v11 = vadd.f32 %v1229_v9, %v1215_v10 }
 0x521   : > { %v1228_v4 = vpop.permute.xlu0 %1227 }
 0x522   : > { %v1230_v7 = vsel %vm821_vm9, %v1226_v8, %v1228_v4  ;;  %1242 = vrot.lane.b32.xlu0 %v1235_v11, %s1806_s20 }
 0x523   : > { %v1236_v15 = vadd.f32 %v1230_v7, %v1216_v6 }
 0x525   : > { %1244 = vrot.lane.b32.xlu1 %v1236_v15, %s1806_s20  ;;  %s1724_s20 = scalar_lea.vmem %s1723_s19, 768 }
 0x526   : > { %p1726_p7 = scmp.lt.s32.totalorder %s1724_s20, %s1718_s9 }
 0x528   : > { %p1727_p2 = por %p1726_p7, %p1725_p0 }
 0x52a   : > { %p1728_p5 = pnand %p1727_p2, %p1721_p1 }
 0x591   : > { %v1241_v16 = vpop.permute.xlu1 %1240 }
 0x594   : > { %v1243_v13 = vpop.permute.xlu0 %1242 }
 0x595   : > { %v1246_v14 = vsel %vm226_vm0, %v1241_v16, %v1243_v13 }
 0x596   : > { %1251 = vst [vmem:[%s215_s17] sm:$0xff] %v1246_v14 }
 0x597   : > { %v1245_v17 = vpop.permute.xlu1 %1244 }
 0x598   : > { %v1247_v0 = vsel %vm226_vm0, %v1243_v13, %v1245_v17  ;;  %1253 = vst.msk [vmem:[%s215_s17 + $0x10] sm:$0xff] %vm858_vm11, %v1245_v17 }
 0x599   : > { %1252 = vst [vmem:[%s215_s17 + $0x8] sm:$0xff] %v1247_v0  ;;  %1255 = vst.msk [vmem:[%s215_s17 + $0x10] sm:$0xff] %vm1254_vm3, %v1812_v2 }
 0x59a   : > { %1731 = shalt.err (!%p1728_p5)
}
 0x59b   : > { %s1732_s4 = scalar_lea.hbm %s2265_s8, 384  ;;  %s1736_s6 = scalar_lea.hbm %s2315_s3, 768 }
 0x59c   : > { %p1733_p11 = scmp.ne.s32.totalorder %s2265_s8, %s1732_s4  ;;  %p1737_p6 = scmp.lt.u32.totalorder %s2265_s8, %s2315_s3 }
 0x59d   : > { %p1738_p8 = scmp.lt.u32.totalorder %s1736_s6, %s1732_s4  ;;  %p1740_p3 = scmp.lt.u32.totalorder %s1732_s4, %s2265_s8 }
 0x59e   : > { %p1734_p12 = pnand %p1733_p11, %p2335_p9 }
 0x59f   : > { %p1739_p13 = por %p1738_p8, %p1737_p6 }
 0x5a0   : > { %p1735_p4 = pneg %p1734_p12 }
 0x5a1   : > { %p1741_p10 = por %p1740_p3, %p1739_p13 }
 0x5a3   : > { %p1742_p1 = pnand %p1741_p10, %p1735_p4 }
 0x5a5   : > { %1745 = shalt.err (!%p1742_p1)
}
 0x5a6   : > { %1523 = dma.vmem_to_hbm [thread:$0]  (%p2335_p9), %s2267_s23, 384, %s2265_s8, %s1257_s16  }
 0x5a7 PF: > { %s1283_s28 = sand.u32 1, %s1776_s12   ;;  %p2336_p0 = scmp.ne.s32.totalorder %s2324_s25, 0 }
 0x5a8   : > { %p2337_p7 = scmp.ge.s32.totalorder %s1788_s15, 2  ;;  %s1284_s22 = scalar_lea.sflag [#allocation6], %s1283_s28 }
 0x5aa   : > { %p1537_p2 = pnand %p2337_p7, %p2336_p0 }
 0x5ac   : > { %1771 = dma.done.wait (!%p1537_p2), %s1284_s22, 384  }
 0x5ad   : > { %1773 = vsyncadd (!%p1537_p2), %s1284_s22, 4294966912  ;;  %p17_p5 = scmp.ge.s32.totalorder %s1861_s18, 4   ;;  %s2338_s12 = smov %s1780_s13 }
 0x5ae   : > { %s2339_s13 = smov %s1784_s14  ;;  %s2340_s14 = smov %s1873_s21 }
 0x5af   : > { %s2341_s15 = smov %s1861_s18  ;;  %19 = sbr.rel (!%p17_p5) target bundleno = 6 (0x6), region = 85 }
 0x5b6   :  { %1289 = vsyncpa [#allocation5], 1 }
 0x5b7   :  { %1291 = vsyncpa [#allocation5 + $0x1], 1 }
 0x5b8   :  { %1292 = vsyncpa [#allocation8], 1 }
 0x5b9   :  { %1293 = vsyncpa [#allocation6], 1 }
 0x5ba   :  { %1295 = vsyncpa [#allocation6 + $0x1], 1 }

</bundles_post_ra>
